<compile_context>
chip_gen: v6e
topology: v6e:2x2x1
jax: 0.10.0
libtpu: 0.0.40
codegen_flags: <defaults>
</compile_context>

<pallas_src>
import functools

import jax
import jax.numpy as jnp
from jax.experimental import pallas as pl
from jax.experimental.pallas import tpu as pltpu


def _round_up(n, m):
    return ((n + m - 1) // m) * m


def _pick_time_chunk(T, target=64):
    """Chunk of the time axis: equal to T (one chunk) or a multiple of 8 dividing T."""
    if T <= target:
        return T
    for c in range(min(target, T), 7, -1):
        if T % c == 0 and c % 8 == 0:
            return c
    return T  # fallback: whole sequence in one chunk


def _gru_proj_kernel(x_ref, wi_ref, whh_ref, bi_ref, bhn_ref, wp_ref, bp_ref,
                     h0_ref, state_ref, hn_ref, gx_ref, hs_ref, h_scr):
    """One time-chunk of: GRU recurrence (PyTorch gate order r,z,n) + Linear proj.

    x_ref     : (B, TC, D)   batch-major input chunk
    wi_ref    : (D, 3*Hp)    [W_ir | W_iz | W_in]^T, gate blocks at Hp boundaries
    whh_ref   : (Hp, 3*Hp)   [W_hr | W_hz | W_hn]^T
    bi_ref    : (1, 3*Hp)    b_ir+b_hr | b_iz+b_hz | b_in
    bhn_ref   : (1, Hp)      b_hn (stays inside the r * (...) term)
    wp_ref    : (Hp, S), bp_ref: (1, S)    state projection
    h0_ref    : (B, Hp)      initial hidden state
    state_ref : (B, TC, S)   output chunk,  hn_ref: (B, Hp) final hidden state
    gx_ref    : (B, TC, 3*Hp) scratch — precomputed input gate pre-activations
    hs_ref    : (B, TC, Hp)   scratch — per-step hidden states (for deferred proj)
    h_scr     : (B, Hp)       scratch — hidden-state carry across chunks
    """
    c = pl.program_id(0)
    B, TC, D = x_ref.shape
    Hp = h_scr.shape[-1]
    S = state_ref.shape[-1]

    @pl.when(c == 0)
    def _init():
        h_scr[...] = h0_ref[...]

    # --- (1) hoisted input projection: one big MXU matmul for the whole chunk.
    x2 = x_ref[...].reshape(B * TC, D)
    gx = jnp.dot(x2, wi_ref[...], preferred_element_type=jnp.float32) + bi_ref[...]
    gx_ref[...] = gx.reshape(B, TC, 3 * Hp)

    # Hoisted loop invariants (weights + broadcast bias).
    whh = whh_ref[...]
    b_hn = jnp.broadcast_to(bhn_ref[...], (B, Hp))

    # --- (2) serial recurrence: one fused hidden matmul per step, unrolled.
    h = h_scr[...]
    for t in range(TC):
        gx_t = gx_ref[:, pl.ds(t, 1), :].reshape(B, 3 * Hp)
        gh = jnp.dot(h, whh, preferred_element_type=jnp.float32)  # (B, 3*Hp)
        r = jax.nn.sigmoid(gx_t[:, :Hp] + gh[:, :Hp])
        z = jax.nn.sigmoid(gx_t[:, Hp:2 * Hp] + gh[:, Hp:2 * Hp])
        n = jnp.tanh(gx_t[:, 2 * Hp:] + r * (gh[:, 2 * Hp:] + b_hn))
        h = (1.0 - z) * n + z * h
        hs_ref[:, pl.ds(t, 1), :] = h[:, None, :]

    h_scr[...] = h
    hn_ref[...] = h

    # --- (3) deferred state projection: one dense matmul + single store per chunk.
    hs2 = hs_ref[...].reshape(B * TC, Hp)
    st = jnp.dot(hs2, wp_ref[...], preferred_element_type=jnp.float32) + bp_ref[...]
    state_ref[...] = st.reshape(B, TC, S)


def _build_kernel_params(params, D, H, S, Hp, dtype=jnp.float32):
    w_ih = params["w_ih"].astype(dtype)   # (3H, D) gate order r, z, n
    w_hh = params["w_hh"].astype(dtype)   # (3H, H)
    b_ih = params["b_ih"].astype(dtype)   # (3H,)
    b_hh = params["b_hh"].astype(dtype)   # (3H,)

    wi_cat = jnp.zeros((D, 3 * Hp), dtype)
    whh_cat = jnp.zeros((Hp, 3 * Hp), dtype)
    bi_cat = jnp.zeros((1, 3 * Hp), dtype)
    for g in range(3):
        wi_cat = wi_cat.at[:, g * Hp:g * Hp + H].set(w_ih[g * H:(g + 1) * H, :].T)
        whh_cat = whh_cat.at[:H, g * Hp:g * Hp + H].set(w_hh[g * H:(g + 1) * H, :].T)
    bi_cat = bi_cat.at[0, 0 * Hp:0 * Hp + H].set(b_ih[:H] + b_hh[:H])
    bi_cat = bi_cat.at[0, 1 * Hp:1 * Hp + H].set(b_ih[H:2 * H] + b_hh[H:2 * H])
    bi_cat = bi_cat.at[0, 2 * Hp:2 * Hp + H].set(b_ih[2 * H:])
    b_hn = jnp.zeros((1, Hp), dtype).at[0, :H].set(b_hh[2 * H:])

    wp = jnp.zeros((Hp, S), dtype).at[:H, :].set(params["w_proj"].astype(dtype).T)
    bp = params["b_proj"].astype(dtype).reshape(1, S)
    return wi_cat, whh_cat, bi_cat, b_hn, wp, bp


def four_dssm_forward(x, params, h0=None, time_chunk=64):
    """x: (B, T, D) batch_first float32 (like PyTorch). Returns (state, hn).

    state: (B, T, state_dim), hn: (1, B, hidden_dim)  (num_layers = 1).
    """
    B, T, D = x.shape
    H = params["w_hh"].shape[1]
    S = params["w_proj"].shape[0]
    Hp = _round_up(max(H, 1), 128)         # pad hidden dim to full lane tiles

    wi_cat, whh_cat, bi_cat, b_hn, wp, bp = _build_kernel_params(params, D, H, S, Hp)

    if h0 is None:
        h0_p = jnp.zeros((B, Hp), jnp.float32)
    else:
        h0_p = jnp.zeros((B, Hp), jnp.float32).at[:, :H].set(h0[0].astype(jnp.float32))

    x = x.astype(jnp.float32)
    TC = _pick_time_chunk(T, time_chunk)
    n_chunks = T // TC

    grid_spec = pltpu.PrefetchScalarGridSpec(
        num_scalar_prefetch=0,
        grid=(n_chunks,),
        in_specs=[
            pl.BlockSpec((B, TC, D), lambda c: (0, c, 0)),      # x  (time-chunked)
            pl.BlockSpec((D, 3 * Hp), lambda c: (0, 0)),        # wi_cat (resident)
            pl.BlockSpec((Hp, 3 * Hp), lambda c: (0, 0)),       # whh_cat
            pl.BlockSpec((1, 3 * Hp), lambda c: (0, 0)),        # bi_cat
            pl.BlockSpec((1, Hp), lambda c: (0, 0)),            # b_hn
            pl.BlockSpec((Hp, S), lambda c: (0, 0)),            # wp
            pl.BlockSpec((1, S), lambda c: (0, 0)),             # bp
            pl.BlockSpec((B, Hp), lambda c: (0, 0)),            # h0
        ],
        out_specs=(
            pl.BlockSpec((B, TC, S), lambda c: (0, c, 0)),      # state (time-chunked)
            pl.BlockSpec((B, Hp), lambda c: (0, 0)),            # hn (resident)
        ),
        scratch_shapes=[
            pltpu.VMEM((B, TC, 3 * Hp), jnp.float32),           # gx  (input gates)
            pltpu.VMEM((B, TC, Hp), jnp.float32),               # hs  (hidden history)
            pltpu.VMEM((B, Hp), jnp.float32),                   # h carry across chunks
        ],
    )

    cost = pl.CostEstimate(
        flops=2 * B * T * (D * 3 * Hp + Hp * 3 * Hp + Hp * S),
        transcendentals=3 * B * T * Hp,
        bytes_accessed=4 * (B * T * (D + S) + 2 * B * Hp
                            + (D + Hp) * 3 * Hp + 3 * Hp + Hp + Hp * S + S),
    )

    state, hn_p = pl.pallas_call(
        _gru_proj_kernel,
        out_shape=(jax.ShapeDtypeStruct((B, T, S), jnp.float32),
                   jax.ShapeDtypeStruct((B, Hp), jnp.float32)),
        grid_spec=grid_spec,
        compiler_params=pltpu.CompilerParams(dimension_semantics=("arbitrary",)),
        cost_estimate=cost,
    )(x, wi_cat, whh_cat, bi_cat, b_hn, wp, bp, h0_p)

    return state, hn_p[None, :, :H]


def four_dssm_reference(x, params, h0=None):
    """Pure-JAX reference identical to PyTorch GRU + Linear semantics."""
    B, T, _ = x.shape
    H = params["w_hh"].shape[1]
    h = jnp.zeros((B, H), jnp.float32) if h0 is None else h0[0]
    w_ih, w_hh = params["w_ih"], params["w_hh"]
    b_ih, b_hh = params["b_ih"], params["b_hh"]
    outs = []
    for t in range(T):
        xt = x[:, t]
        gx = xt @ w_ih.T + b_ih
        gh = h @ w_hh.T + b_hh
        r = jax.nn.sigmoid(gx[:, :H] + gh[:, :H])
        z = jax.nn.sigmoid(gx[:, H:2 * H] + gh[:, H:2 * H])
        n = jnp.tanh(gx[:, 2 * H:] + r * gh[:, 2 * H:])
        h = (1.0 - z) * n + z * h
        outs.append(h)
    out = jnp.stack(outs, axis=1)                      # (B, T, H)
    state = out @ params["w_proj"].T + params["b_proj"]
    return state, h[None]


if __name__ == "__main__":
    # Module defaults: input_dim=4, hidden_dim=32, state_dim=4, num_layers=1
    B, T, D, H, S = 2, 8, 4, 32, 4

    key = jax.random.PRNGKey(0)
    ks = jax.random.split(key, 7)
    k = 1.0 / jnp.sqrt(jnp.float32(H))   # PyTorch default uniform(-1/sqrt(H), 1/sqrt(H))
    params = {
        "w_ih":   jax.random.uniform(ks[0], (3 * H, D), jnp.float32, -k, k),
        "w_hh":   jax.random.uniform(ks[1], (3 * H, H), jnp.float32, -k, k),
        "b_ih":   jax.random.uniform(ks[2], (3 * H,),   jnp.float32, -k, k),
        "b_hh":   jax.random.uniform(ks[3], (3 * H,),   jnp.float32, -k, k),
        "w_proj": jax.random.uniform(ks[4], (S, H),     jnp.float32, -k, k),
        "b_proj": jax.random.uniform(ks[5], (S,),       jnp.float32, -k, k),
    }
    x = jax.random.normal(ks[6], (B, T, D), jnp.float32)

    fwd = jax.jit(functools.partial(four_dssm_forward, params=params))
    state, hn = fwd(x)
    jax.block_until_ready((state, hn))

    state_ref, hn_ref = four_dssm_reference(x, params)
    assert state.shape == (B, T, S) and hn.shape == (1, B, H)
    assert jnp.allclose(state, state_ref, atol=1e-5, rtol=1e-5)
    assert jnp.allclose(hn, hn_ref, atol=1e-5, rtol=1e-5)

    print("KERNEL_OK")
</pallas_src>

<mosaic_0001>
module attributes {stable_mosaic.version = 11 : i64} {
  func.func @_gru_proj_kernel(%arg0: i32, %arg1: memref<2x8x4xf32, #tpu.memory_space<vmem>>, %arg2: memref<4x384xf32, #tpu.memory_space<vmem>>, %arg3: memref<128x384xf32, #tpu.memory_space<vmem>>, %arg4: memref<1x384xf32, #tpu.memory_space<vmem>>, %arg5: memref<1x128xf32, #tpu.memory_space<vmem>>, %arg6: memref<128x4xf32, #tpu.memory_space<vmem>>, %arg7: memref<1x4xf32, #tpu.memory_space<vmem>>, %arg8: memref<2x128xf32, #tpu.memory_space<vmem>>, %arg9: memref<2x8x4xf32, #tpu.memory_space<vmem>>, %arg10: memref<2x128xf32, #tpu.memory_space<vmem>>, %arg11: memref<2x8x384xf32, #tpu.memory_space<vmem>>, %arg12: memref<2x8x128xf32, #tpu.memory_space<vmem>>, %arg13: memref<2x128xf32, #tpu.memory_space<vmem>>) attributes {dimension_semantics = [#tpu.dimension_semantics<arbitrary>], iteration_bounds = array<i64: 1>, scalar_prefetch = 0 : i64, scratch_operands = 3 : i64, tpu.core_type = #tpu.core_type<tc>, window_params = [{transform_indices = @transform_0, window_bounds = array<i64: 2, 8, 4>}, {pipeline_mode = #tpu.pipeline_mode<synchronous>, transform_indices = @transform_1, window_bounds = array<i64: 4, 384>}, {pipeline_mode = #tpu.pipeline_mode<synchronous>, transform_indices = @transform_2, window_bounds = array<i64: 128, 384>}, {pipeline_mode = #tpu.pipeline_mode<synchronous>, transform_indices = @transform_3, window_bounds = array<i64: 1, 384>}, {pipeline_mode = #tpu.pipeline_mode<synchronous>, transform_indices = @transform_4, window_bounds = array<i64: 1, 128>}, {pipeline_mode = #tpu.pipeline_mode<synchronous>, transform_indices = @transform_5, window_bounds = array<i64: 128, 4>}, {pipeline_mode = #tpu.pipeline_mode<synchronous>, transform_indices = @transform_6, window_bounds = array<i64: 1, 4>}, {pipeline_mode = #tpu.pipeline_mode<synchronous>, transform_indices = @transform_7, window_bounds = array<i64: 2, 128>}, {transform_indices = @transform_8, window_bounds = array<i64: 2, 8, 4>}, {pipeline_mode = #tpu.pipeline_mode<synchronous>, transform_indices = @transform_9, window_bounds = array<i64: 2, 128>}]} {
    %c0_i32 = arith.constant 0 : i32
    %0 = arith.cmpi eq, %arg0, %c0_i32 : i32
    %1 = arith.extui %0 : i1 to i32
    %c0_i32_0 = arith.constant 0 : i32
    %2 = arith.cmpi ne, %1, %c0_i32_0 : i32
    scf.if %2 {
      %c0_104 = arith.constant 0 : index
      %c0_105 = arith.constant 0 : index
      %284 = vector.load %arg8[%c0_104, %c0_105] : memref<2x128xf32, #tpu.memory_space<vmem>>, vector<2x128xf32>
      %c0_106 = arith.constant 0 : index
      %c0_107 = arith.constant 0 : index
      %285 = vector.load %arg13[%c0_106, %c0_107] : memref<2x128xf32, #tpu.memory_space<vmem>>, vector<2x128xf32>
      tpu.vector_store %arg13[%c0_106, %c0_107], %284 {strides = array<i32>} : memref<2x128xf32, #tpu.memory_space<vmem>>, vector<2x128xf32>,
    } else {
    }
    %c0 = arith.constant 0 : index
    %c0_1 = arith.constant 0 : index
    %c0_2 = arith.constant 0 : index
    %3 = vector.load %arg1[%c0, %c0_1, %c0_2] : memref<2x8x4xf32, #tpu.memory_space<vmem>>, vector<2x8x4xf32>
    %4 = vector.shape_cast %3 : vector<2x8x4xf32> to vector<16x4xf32>
    %c0_3 = arith.constant 0 : index
    %c0_4 = arith.constant 0 : index
    %5 = vector.load %arg2[%c0_3, %c0_4] : memref<4x384xf32, #tpu.memory_space<vmem>>, vector<4x384xf32>
    %cst = arith.constant dense<0.000000e+00> : vector<16x384xf32>
    %6 = tpu.matmul %4, %5, %cst {dimension_numbers = #tpu.dot_dimension_numbers<[1], [0], [0], [1], [0, 0, 1, 1], [], []>} : vector<16x4xf32>, vector<4x384xf32>, vector<16x384xf32> -> vector<16x384xf32>
    %c0_5 = arith.constant 0 : index
    %c0_6 = arith.constant 0 : index
    %7 = vector.load %arg4[%c0_5, %c0_6] : memref<1x384xf32, #tpu.memory_space<vmem>>, vector<1x384xf32>
    %8 = vector.broadcast %7 : vector<1x384xf32> to vector<16x384xf32>
    %9 = arith.addf %6, %8 : vector<16x384xf32>
    %10 = vector.shape_cast %9 : vector<16x384xf32> to vector<2x8x384xf32>
    %c0_7 = arith.constant 0 : index
    %c0_8 = arith.constant 0 : index
    %c0_9 = arith.constant 0 : index
    %11 = vector.load %arg11[%c0_7, %c0_8, %c0_9] : memref<2x8x384xf32, #tpu.memory_space<vmem>>, vector<2x8x384xf32>
    tpu.vector_store %arg11[%c0_7, %c0_8, %c0_9], %10 {strides = array<i32>} : memref<2x8x384xf32, #tpu.memory_space<vmem>>, vector<2x8x384xf32>,
    %c0_10 = arith.constant 0 : index
    %c0_11 = arith.constant 0 : index
    %12 = vector.load %arg3[%c0_10, %c0_11] : memref<128x384xf32, #tpu.memory_space<vmem>>, vector<128x384xf32>
    %c0_12 = arith.constant 0 : index
    %c0_13 = arith.constant 0 : index
    %13 = vector.load %arg5[%c0_12, %c0_13] : memref<1x128xf32, #tpu.memory_space<vmem>>, vector<1x128xf32>
    %14 = vector.shape_cast %13 : vector<1x128xf32> to vector<1x128xf32>
    %15 = vector.broadcast %14 : vector<1x128xf32> to vector<2x128xf32>
    %c0_14 = arith.constant 0 : index
    %c0_15 = arith.constant 0 : index
    %16 = vector.load %arg13[%c0_14, %c0_15] : memref<2x128xf32, #tpu.memory_space<vmem>>, vector<2x128xf32>
    %c0_16 = arith.constant 0 : index
    %c0_17 = arith.constant 0 : index
    %c0_18 = arith.constant 0 : index
    %17 = vector.load %arg11[%c0_16, %c0_17, %c0_18] : memref<2x8x384xf32, #tpu.memory_space<vmem>>, vector<2x1x384xf32>
    %18 = vector.shape_cast %17 : vector<2x1x384xf32> to vector<2x384xf32>
    %cst_19 = arith.constant dense<0.000000e+00> : vector<2x384xf32>
    %19 = tpu.matmul %16, %12, %cst_19 {dimension_numbers = #tpu.dot_dimension_numbers<[1], [0], [0], [1], [0, 0, 1, 1], [], []>} : vector<2x128xf32>, vector<128x384xf32>, vector<2x384xf32> -> vector<2x384xf32>
    %20 = vector.extract_strided_slice %18 {offsets = [0, 0], sizes = [2, 128], strides = [1, 1]} : vector<2x384xf32> to vector<2x128xf32>
    %21 = vector.extract_strided_slice %19 {offsets = [0, 0], sizes = [2, 128], strides = [1, 1]} : vector<2x384xf32> to vector<2x128xf32>
    %22 = arith.addf %20, %21 : vector<2x128xf32>
    %23 = arith.negf %22 : vector<2x128xf32>
    %24 = math.exp %23 : vector<2x128xf32>
    %cst_20 = arith.constant 1.000000e+00 : f32
    %25 = vector.broadcast %cst_20 : f32 to vector<2x128xf32>
    %26 = arith.addf %25, %24 : vector<2x128xf32>
    %27 = arith.divf %25, %26 : vector<2x128xf32>
    %28 = vector.extract_strided_slice %18 {offsets = [0, 128], sizes = [2, 128], strides = [1, 1]} : vector<2x384xf32> to vector<2x128xf32>
    %29 = vector.extract_strided_slice %19 {offsets = [0, 128], sizes = [2, 128], strides = [1, 1]} : vector<2x384xf32> to vector<2x128xf32>
    %30 = arith.addf %28, %29 : vector<2x128xf32>
    %31 = arith.negf %30 : vector<2x128xf32>
    %32 = math.exp %31 : vector<2x128xf32>
    %cst_21 = arith.constant 1.000000e+00 : f32
    %33 = vector.broadcast %cst_21 : f32 to vector<2x128xf32>
    %34 = arith.addf %33, %32 : vector<2x128xf32>
    %35 = arith.divf %33, %34 : vector<2x128xf32>
    %36 = vector.extract_strided_slice %18 {offsets = [0, 256], sizes = [2, 128], strides = [1, 1]} : vector<2x384xf32> to vector<2x128xf32>
    %37 = vector.extract_strided_slice %19 {offsets = [0, 256], sizes = [2, 128], strides = [1, 1]} : vector<2x384xf32> to vector<2x128xf32>
    %38 = arith.addf %37, %15 : vector<2x128xf32>
    %39 = arith.mulf %27, %38 : vector<2x128xf32>
    %40 = arith.addf %36, %39 : vector<2x128xf32>
    %41 = math.tanh %40 : vector<2x128xf32>
    %cst_22 = arith.constant 1.000000e+00 : f32
    %42 = vector.broadcast %cst_22 : f32 to vector<2x128xf32>
    %43 = arith.subf %42, %35 : vector<2x128xf32>
    %44 = arith.mulf %43, %41 : vector<2x128xf32>
    %45 = arith.mulf %35, %16 : vector<2x128xf32>
    %46 = arith.addf %44, %45 : vector<2x128xf32>
    %47 = vector.shape_cast %46 : vector<2x128xf32> to vector<2x1x128xf32>
    %c0_23 = arith.constant 0 : index
    %c0_24 = arith.constant 0 : index
    %c0_25 = arith.constant 0 : index
    %48 = vector.load %arg12[%c0_23, %c0_24, %c0_25] : memref<2x8x128xf32, #tpu.memory_space<vmem>>, vector<2x1x128xf32>
    tpu.vector_store %arg12[%c0_23, %c0_24, %c0_25], %47 {strides = array<i32>} : memref<2x8x128xf32, #tpu.memory_space<vmem>>, vector<2x1x128xf32>,
    %c0_26 = arith.constant 0 : index
    %c1 = arith.constant 1 : index
    %c0_27 = arith.constant 0 : index
    %49 = vector.load %arg11[%c0_26, %c1, %c0_27] : memref<2x8x384xf32, #tpu.memory_space<vmem>>, vector<2x1x384xf32>
    %50 = vector.shape_cast %49 : vector<2x1x384xf32> to vector<2x384xf32>
    %cst_28 = arith.constant dense<0.000000e+00> : vector<2x384xf32>
    %51 = tpu.matmul %46, %12, %cst_28 {dimension_numbers = #tpu.dot_dimension_numbers<[1], [0], [0], [1], [0, 0, 1, 1], [], []>} : vector<2x128xf32>, vector<128x384xf32>, vector<2x384xf32> -> vector<2x384xf32>
    %52 = vector.extract_strided_slice %50 {offsets = [0, 0], sizes = [2, 128], strides = [1, 1]} : vector<2x384xf32> to vector<2x128xf32>
    %53 = vector.extract_strided_slice %51 {offsets = [0, 0], sizes = [2, 128], strides = [1, 1]} : vector<2x384xf32> to vector<2x128xf32>
    %54 = arith.addf %52, %53 : vector<2x128xf32>
    %55 = arith.negf %54 : vector<2x128xf32>
    %56 = math.exp %55 : vector<2x128xf32>
    %cst_29 = arith.constant 1.000000e+00 : f32
    %57 = vector.broadcast %cst_29 : f32 to vector<2x128xf32>
    %58 = arith.addf %57, %56 : vector<2x128xf32>
    %59 = arith.divf %57, %58 : vector<2x128xf32>
    %60 = vector.extract_strided_slice %50 {offsets = [0, 128], sizes = [2, 128], strides = [1, 1]} : vector<2x384xf32> to vector<2x128xf32>
    %61 = vector.extract_strided_slice %51 {offsets = [0, 128], sizes = [2, 128], strides = [1, 1]} : vector<2x384xf32> to vector<2x128xf32>
    %62 = arith.addf %60, %61 : vector<2x128xf32>
    %63 = arith.negf %62 : vector<2x128xf32>
    %64 = math.exp %63 : vector<2x128xf32>
    %cst_30 = arith.constant 1.000000e+00 : f32
    %65 = vector.broadcast %cst_30 : f32 to vector<2x128xf32>
    %66 = arith.addf %65, %64 : vector<2x128xf32>
    %67 = arith.divf %65, %66 : vector<2x128xf32>
    %68 = vector.extract_strided_slice %50 {offsets = [0, 256], sizes = [2, 128], strides = [1, 1]} : vector<2x384xf32> to vector<2x128xf32>
    %69 = vector.extract_strided_slice %51 {offsets = [0, 256], sizes = [2, 128], strides = [1, 1]} : vector<2x384xf32> to vector<2x128xf32>
    %70 = arith.addf %69, %15 : vector<2x128xf32>
    %71 = arith.mulf %59, %70 : vector<2x128xf32>
    %72 = arith.addf %68, %71 : vector<2x128xf32>
    %73 = math.tanh %72 : vector<2x128xf32>
    %cst_31 = arith.constant 1.000000e+00 : f32
    %74 = vector.broadcast %cst_31 : f32 to vector<2x128xf32>
    %75 = arith.subf %74, %67 : vector<2x128xf32>
    %76 = arith.mulf %75, %73 : vector<2x128xf32>
    %77 = arith.mulf %67, %46 : vector<2x128xf32>
    %78 = arith.addf %76, %77 : vector<2x128xf32>
    %79 = vector.shape_cast %78 : vector<2x128xf32> to vector<2x1x128xf32>
    %c0_32 = arith.constant 0 : index
    %c1_33 = arith.constant 1 : index
    %c0_34 = arith.constant 0 : index
    %80 = vector.load %arg12[%c0_32, %c1_33, %c0_34] : memref<2x8x128xf32, #tpu.memory_space<vmem>>, vector<2x1x128xf32>
    tpu.vector_store %arg12[%c0_32, %c1_33, %c0_34], %79 {strides = array<i32>} : memref<2x8x128xf32, #tpu.memory_space<vmem>>, vector<2x1x128xf32>,
    %c0_35 = arith.constant 0 : index
    %c2 = arith.constant 2 : index
    %c0_36 = arith.constant 0 : index
    %81 = vector.load %arg11[%c0_35, %c2, %c0_36] : memref<2x8x384xf32, #tpu.memory_space<vmem>>, vector<2x1x384xf32>
    %82 = vector.shape_cast %81 : vector<2x1x384xf32> to vector<2x384xf32>
    %cst_37 = arith.constant dense<0.000000e+00> : vector<2x384xf32>
    %83 = tpu.matmul %78, %12, %cst_37 {dimension_numbers = #tpu.dot_dimension_numbers<[1], [0], [0], [1], [0, 0, 1, 1], [], []>} : vector<2x128xf32>, vector<128x384xf32>, vector<2x384xf32> -> vector<2x384xf32>
    %84 = vector.extract_strided_slice %82 {offsets = [0, 0], sizes = [2, 128], strides = [1, 1]} : vector<2x384xf32> to vector<2x128xf32>
    %85 = vector.extract_strided_slice %83 {offsets = [0, 0], sizes = [2, 128], strides = [1, 1]} : vector<2x384xf32> to vector<2x128xf32>
    %86 = arith.addf %84, %85 : vector<2x128xf32>
    %87 = arith.negf %86 : vector<2x128xf32>
    %88 = math.exp %87 : vector<2x128xf32>
    %cst_38 = arith.constant 1.000000e+00 : f32
    %89 = vector.broadcast %cst_38 : f32 to vector<2x128xf32>
    %90 = arith.addf %89, %88 : vector<2x128xf32>
    %91 = arith.divf %89, %90 : vector<2x128xf32>
    %92 = vector.extract_strided_slice %82 {offsets = [0, 128], sizes = [2, 128], strides = [1, 1]} : vector<2x384xf32> to vector<2x128xf32>
    %93 = vector.extract_strided_slice %83 {offsets = [0, 128], sizes = [2, 128], strides = [1, 1]} : vector<2x384xf32> to vector<2x128xf32>
    %94 = arith.addf %92, %93 : vector<2x128xf32>
    %95 = arith.negf %94 : vector<2x128xf32>
    %96 = math.exp %95 : vector<2x128xf32>
    %cst_39 = arith.constant 1.000000e+00 : f32
    %97 = vector.broadcast %cst_39 : f32 to vector<2x128xf32>
    %98 = arith.addf %97, %96 : vector<2x128xf32>
    %99 = arith.divf %97, %98 : vector<2x128xf32>
    %100 = vector.extract_strided_slice %82 {offsets = [0, 256], sizes = [2, 128], strides = [1, 1]} : vector<2x384xf32> to vector<2x128xf32>
    %101 = vector.extract_strided_slice %83 {offsets = [0, 256], sizes = [2, 128], strides = [1, 1]} : vector<2x384xf32> to vector<2x128xf32>
    %102 = arith.addf %101, %15 : vector<2x128xf32>
    %103 = arith.mulf %91, %102 : vector<2x128xf32>
    %104 = arith.addf %100, %103 : vector<2x128xf32>
    %105 = math.tanh %104 : vector<2x128xf32>
    %cst_40 = arith.constant 1.000000e+00 : f32
    %106 = vector.broadcast %cst_40 : f32 to vector<2x128xf32>
    %107 = arith.subf %106, %99 : vector<2x128xf32>
    %108 = arith.mulf %107, %105 : vector<2x128xf32>
    %109 = arith.mulf %99, %78 : vector<2x128xf32>
    %110 = arith.addf %108, %109 : vector<2x128xf32>
    %111 = vector.shape_cast %110 : vector<2x128xf32> to vector<2x1x128xf32>
    %c0_41 = arith.constant 0 : index
    %c2_42 = arith.constant 2 : index
    %c0_43 = arith.constant 0 : index
    %112 = vector.load %arg12[%c0_41, %c2_42, %c0_43] : memref<2x8x128xf32, #tpu.memory_space<vmem>>, vector<2x1x128xf32>
    tpu.vector_store %arg12[%c0_41, %c2_42, %c0_43], %111 {strides = array<i32>} : memref<2x8x128xf32, #tpu.memory_space<vmem>>, vector<2x1x128xf32>,
    %c0_44 = arith.constant 0 : index
    %c3 = arith.constant 3 : index
    %c0_45 = arith.constant 0 : index
    %113 = vector.load %arg11[%c0_44, %c3, %c0_45] : memref<2x8x384xf32, #tpu.memory_space<vmem>>, vector<2x1x384xf32>
    %114 = vector.shape_cast %113 : vector<2x1x384xf32> to vector<2x384xf32>
    %cst_46 = arith.constant dense<0.000000e+00> : vector<2x384xf32>
    %115 = tpu.matmul %110, %12, %cst_46 {dimension_numbers = #tpu.dot_dimension_numbers<[1], [0], [0], [1], [0, 0, 1, 1], [], []>} : vector<2x128xf32>, vector<128x384xf32>, vector<2x384xf32> -> vector<2x384xf32>
    %116 = vector.extract_strided_slice %114 {offsets = [0, 0], sizes = [2, 128], strides = [1, 1]} : vector<2x384xf32> to vector<2x128xf32>
    %117 = vector.extract_strided_slice %115 {offsets = [0, 0], sizes = [2, 128], strides = [1, 1]} : vector<2x384xf32> to vector<2x128xf32>
    %118 = arith.addf %116, %117 : vector<2x128xf32>
    %119 = arith.negf %118 : vector<2x128xf32>
    %120 = math.exp %119 : vector<2x128xf32>
    %cst_47 = arith.constant 1.000000e+00 : f32
    %121 = vector.broadcast %cst_47 : f32 to vector<2x128xf32>
    %122 = arith.addf %121, %120 : vector<2x128xf32>
    %123 = arith.divf %121, %122 : vector<2x128xf32>
    %124 = vector.extract_strided_slice %114 {offsets = [0, 128], sizes = [2, 128], strides = [1, 1]} : vector<2x384xf32> to vector<2x128xf32>
    %125 = vector.extract_strided_slice %115 {offsets = [0, 128], sizes = [2, 128], strides = [1, 1]} : vector<2x384xf32> to vector<2x128xf32>
    %126 = arith.addf %124, %125 : vector<2x128xf32>
    %127 = arith.negf %126 : vector<2x128xf32>
    %128 = math.exp %127 : vector<2x128xf32>
    %cst_48 = arith.constant 1.000000e+00 : f32
    %129 = vector.broadcast %cst_48 : f32 to vector<2x128xf32>
    %130 = arith.addf %129, %128 : vector<2x128xf32>
    %131 = arith.divf %129, %130 : vector<2x128xf32>
    %132 = vector.extract_strided_slice %114 {offsets = [0, 256], sizes = [2, 128], strides = [1, 1]} : vector<2x384xf32> to vector<2x128xf32>
    %133 = vector.extract_strided_slice %115 {offsets = [0, 256], sizes = [2, 128], strides = [1, 1]} : vector<2x384xf32> to vector<2x128xf32>
    %134 = arith.addf %133, %15 : vector<2x128xf32>
    %135 = arith.mulf %123, %134 : vector<2x128xf32>
    %136 = arith.addf %132, %135 : vector<2x128xf32>
    %137 = math.tanh %136 : vector<2x128xf32>
    %cst_49 = arith.constant 1.000000e+00 : f32
    %138 = vector.broadcast %cst_49 : f32 to vector<2x128xf32>
    %139 = arith.subf %138, %131 : vector<2x128xf32>
    %140 = arith.mulf %139, %137 : vector<2x128xf32>
    %141 = arith.mulf %131, %110 : vector<2x128xf32>
    %142 = arith.addf %140, %141 : vector<2x128xf32>
    %143 = vector.shape_cast %142 : vector<2x128xf32> to vector<2x1x128xf32>
    %c0_50 = arith.constant 0 : index
    %c3_51 = arith.constant 3 : index
    %c0_52 = arith.constant 0 : index
    %144 = vector.load %arg12[%c0_50, %c3_51, %c0_52] : memref<2x8x128xf32, #tpu.memory_space<vmem>>, vector<2x1x128xf32>
    tpu.vector_store %arg12[%c0_50, %c3_51, %c0_52], %143 {strides = array<i32>} : memref<2x8x128xf32, #tpu.memory_space<vmem>>, vector<2x1x128xf32>,
    %c0_53 = arith.constant 0 : index
    %c4 = arith.constant 4 : index
    %c0_54 = arith.constant 0 : index
    %145 = vector.load %arg11[%c0_53, %c4, %c0_54] : memref<2x8x384xf32, #tpu.memory_space<vmem>>, vector<2x1x384xf32>
    %146 = vector.shape_cast %145 : vector<2x1x384xf32> to vector<2x384xf32>
    %cst_55 = arith.constant dense<0.000000e+00> : vector<2x384xf32>
    %147 = tpu.matmul %142, %12, %cst_55 {dimension_numbers = #tpu.dot_dimension_numbers<[1], [0], [0], [1], [0, 0, 1, 1], [], []>} : vector<2x128xf32>, vector<128x384xf32>, vector<2x384xf32> -> vector<2x384xf32>
    %148 = vector.extract_strided_slice %146 {offsets = [0, 0], sizes = [2, 128], strides = [1, 1]} : vector<2x384xf32> to vector<2x128xf32>
    %149 = vector.extract_strided_slice %147 {offsets = [0, 0], sizes = [2, 128], strides = [1, 1]} : vector<2x384xf32> to vector<2x128xf32>
    %150 = arith.addf %148, %149 : vector<2x128xf32>
    %151 = arith.negf %150 : vector<2x128xf32>
    %152 = math.exp %151 : vector<2x128xf32>
    %cst_56 = arith.constant 1.000000e+00 : f32
    %153 = vector.broadcast %cst_56 : f32 to vector<2x128xf32>
    %154 = arith.addf %153, %152 : vector<2x128xf32>
    %155 = arith.divf %153, %154 : vector<2x128xf32>
    %156 = vector.extract_strided_slice %146 {offsets = [0, 128], sizes = [2, 128], strides = [1, 1]} : vector<2x384xf32> to vector<2x128xf32>
    %157 = vector.extract_strided_slice %147 {offsets = [0, 128], sizes = [2, 128], strides = [1, 1]} : vector<2x384xf32> to vector<2x128xf32>
    %158 = arith.addf %156, %157 : vector<2x128xf32>
    %159 = arith.negf %158 : vector<2x128xf32>
    %160 = math.exp %159 : vector<2x128xf32>
    %cst_57 = arith.constant 1.000000e+00 : f32
    %161 = vector.broadcast %cst_57 : f32 to vector<2x128xf32>
    %162 = arith.addf %161, %160 : vector<2x128xf32>
    %163 = arith.divf %161, %162 : vector<2x128xf32>
    %164 = vector.extract_strided_slice %146 {offsets = [0, 256], sizes = [2, 128], strides = [1, 1]} : vector<2x384xf32> to vector<2x128xf32>
    %165 = vector.extract_strided_slice %147 {offsets = [0, 256], sizes = [2, 128], strides = [1, 1]} : vector<2x384xf32> to vector<2x128xf32>
    %166 = arith.addf %165, %15 : vector<2x128xf32>
    %167 = arith.mulf %155, %166 : vector<2x128xf32>
    %168 = arith.addf %164, %167 : vector<2x128xf32>
    %169 = math.tanh %168 : vector<2x128xf32>
    %cst_58 = arith.constant 1.000000e+00 : f32
    %170 = vector.broadcast %cst_58 : f32 to vector<2x128xf32>
    %171 = arith.subf %170, %163 : vector<2x128xf32>
    %172 = arith.mulf %171, %169 : vector<2x128xf32>
    %173 = arith.mulf %163, %142 : vector<2x128xf32>
    %174 = arith.addf %172, %173 : vector<2x128xf32>
    %175 = vector.shape_cast %174 : vector<2x128xf32> to vector<2x1x128xf32>
    %c0_59 = arith.constant 0 : index
    %c4_60 = arith.constant 4 : index
    %c0_61 = arith.constant 0 : index
    %176 = vector.load %arg12[%c0_59, %c4_60, %c0_61] : memref<2x8x128xf32, #tpu.memory_space<vmem>>, vector<2x1x128xf32>
    tpu.vector_store %arg12[%c0_59, %c4_60, %c0_61], %175 {strides = array<i32>} : memref<2x8x128xf32, #tpu.memory_space<vmem>>, vector<2x1x128xf32>,
    %c0_62 = arith.constant 0 : index
    %c5 = arith.constant 5 : index
    %c0_63 = arith.constant 0 : index
    %177 = vector.load %arg11[%c0_62, %c5, %c0_63] : memref<2x8x384xf32, #tpu.memory_space<vmem>>, vector<2x1x384xf32>
    %178 = vector.shape_cast %177 : vector<2x1x384xf32> to vector<2x384xf32>
    %cst_64 = arith.constant dense<0.000000e+00> : vector<2x384xf32>
    %179 = tpu.matmul %174, %12, %cst_64 {dimension_numbers = #tpu.dot_dimension_numbers<[1], [0], [0], [1], [0, 0, 1, 1], [], []>} : vector<2x128xf32>, vector<128x384xf32>, vector<2x384xf32> -> vector<2x384xf32>
    %180 = vector.extract_strided_slice %178 {offsets = [0, 0], sizes = [2, 128], strides = [1, 1]} : vector<2x384xf32> to vector<2x128xf32>
    %181 = vector.extract_strided_slice %179 {offsets = [0, 0], sizes = [2, 128], strides = [1, 1]} : vector<2x384xf32> to vector<2x128xf32>
    %182 = arith.addf %180, %181 : vector<2x128xf32>
    %183 = arith.negf %182 : vector<2x128xf32>
    %184 = math.exp %183 : vector<2x128xf32>
    %cst_65 = arith.constant 1.000000e+00 : f32
    %185 = vector.broadcast %cst_65 : f32 to vector<2x128xf32>
    %186 = arith.addf %185, %184 : vector<2x128xf32>
    %187 = arith.divf %185, %186 : vector<2x128xf32>
    %188 = vector.extract_strided_slice %178 {offsets = [0, 128], sizes = [2, 128], strides = [1, 1]} : vector<2x384xf32> to vector<2x128xf32>
    %189 = vector.extract_strided_slice %179 {offsets = [0, 128], sizes = [2, 128], strides = [1, 1]} : vector<2x384xf32> to vector<2x128xf32>
    %190 = arith.addf %188, %189 : vector<2x128xf32>
    %191 = arith.negf %190 : vector<2x128xf32>
    %192 = math.exp %191 : vector<2x128xf32>
    %cst_66 = arith.constant 1.000000e+00 : f32
    %193 = vector.broadcast %cst_66 : f32 to vector<2x128xf32>
    %194 = arith.addf %193, %192 : vector<2x128xf32>
    %195 = arith.divf %193, %194 : vector<2x128xf32>
    %196 = vector.extract_strided_slice %178 {offsets = [0, 256], sizes = [2, 128], strides = [1, 1]} : vector<2x384xf32> to vector<2x128xf32>
    %197 = vector.extract_strided_slice %179 {offsets = [0, 256], sizes = [2, 128], strides = [1, 1]} : vector<2x384xf32> to vector<2x128xf32>
    %198 = arith.addf %197, %15 : vector<2x128xf32>
    %199 = arith.mulf %187, %198 : vector<2x128xf32>
    %200 = arith.addf %196, %199 : vector<2x128xf32>
    %201 = math.tanh %200 : vector<2x128xf32>
    %cst_67 = arith.constant 1.000000e+00 : f32
    %202 = vector.broadcast %cst_67 : f32 to vector<2x128xf32>
    %203 = arith.subf %202, %195 : vector<2x128xf32>
    %204 = arith.mulf %203, %201 : vector<2x128xf32>
    %205 = arith.mulf %195, %174 : vector<2x128xf32>
    %206 = arith.addf %204, %205 : vector<2x128xf32>
    %207 = vector.shape_cast %206 : vector<2x128xf32> to vector<2x1x128xf32>
    %c0_68 = arith.constant 0 : index
    %c5_69 = arith.constant 5 : index
    %c0_70 = arith.constant 0 : index
    %208 = vector.load %arg12[%c0_68, %c5_69, %c0_70] : memref<2x8x128xf32, #tpu.memory_space<vmem>>, vector<2x1x128xf32>
    tpu.vector_store %arg12[%c0_68, %c5_69, %c0_70], %207 {strides = array<i32>} : memref<2x8x128xf32, #tpu.memory_space<vmem>>, vector<2x1x128xf32>,
    %c0_71 = arith.constant 0 : index
    %c6 = arith.constant 6 : index
    %c0_72 = arith.constant 0 : index
    %209 = vector.load %arg11[%c0_71, %c6, %c0_72] : memref<2x8x384xf32, #tpu.memory_space<vmem>>, vector<2x1x384xf32>
    %210 = vector.shape_cast %209 : vector<2x1x384xf32> to vector<2x384xf32>
    %cst_73 = arith.constant dense<0.000000e+00> : vector<2x384xf32>
    %211 = tpu.matmul %206, %12, %cst_73 {dimension_numbers = #tpu.dot_dimension_numbers<[1], [0], [0], [1], [0, 0, 1, 1], [], []>} : vector<2x128xf32>, vector<128x384xf32>, vector<2x384xf32> -> vector<2x384xf32>
    %212 = vector.extract_strided_slice %210 {offsets = [0, 0], sizes = [2, 128], strides = [1, 1]} : vector<2x384xf32> to vector<2x128xf32>
    %213 = vector.extract_strided_slice %211 {offsets = [0, 0], sizes = [2, 128], strides = [1, 1]} : vector<2x384xf32> to vector<2x128xf32>
    %214 = arith.addf %212, %213 : vector<2x128xf32>
    %215 = arith.negf %214 : vector<2x128xf32>
    %216 = math.exp %215 : vector<2x128xf32>
    %cst_74 = arith.constant 1.000000e+00 : f32
    %217 = vector.broadcast %cst_74 : f32 to vector<2x128xf32>
    %218 = arith.addf %217, %216 : vector<2x128xf32>
    %219 = arith.divf %217, %218 : vector<2x128xf32>
    %220 = vector.extract_strided_slice %210 {offsets = [0, 128], sizes = [2, 128], strides = [1, 1]} : vector<2x384xf32> to vector<2x128xf32>
    %221 = vector.extract_strided_slice %211 {offsets = [0, 128], sizes = [2, 128], strides = [1, 1]} : vector<2x384xf32> to vector<2x128xf32>
    %222 = arith.addf %220, %221 : vector<2x128xf32>
    %223 = arith.negf %222 : vector<2x128xf32>
    %224 = math.exp %223 : vector<2x128xf32>
    %cst_75 = arith.constant 1.000000e+00 : f32
    %225 = vector.broadcast %cst_75 : f32 to vector<2x128xf32>
    %226 = arith.addf %225, %224 : vector<2x128xf32>
    %227 = arith.divf %225, %226 : vector<2x128xf32>
    %228 = vector.extract_strided_slice %210 {offsets = [0, 256], sizes = [2, 128], strides = [1, 1]} : vector<2x384xf32> to vector<2x128xf32>
    %229 = vector.extract_strided_slice %211 {offsets = [0, 256], sizes = [2, 128], strides = [1, 1]} : vector<2x384xf32> to vector<2x128xf32>
    %230 = arith.addf %229, %15 : vector<2x128xf32>
    %231 = arith.mulf %219, %230 : vector<2x128xf32>
    %232 = arith.addf %228, %231 : vector<2x128xf32>
    %233 = math.tanh %232 : vector<2x128xf32>
    %cst_76 = arith.constant 1.000000e+00 : f32
    %234 = vector.broadcast %cst_76 : f32 to vector<2x128xf32>
    %235 = arith.subf %234, %227 : vector<2x128xf32>
    %236 = arith.mulf %235, %233 : vector<2x128xf32>
    %237 = arith.mulf %227, %206 : vector<2x128xf32>
    %238 = arith.addf %236, %237 : vector<2x128xf32>
    %239 = vector.shape_cast %238 : vector<2x128xf32> to vector<2x1x128xf32>
    %c0_77 = arith.constant 0 : index
    %c6_78 = arith.constant 6 : index
    %c0_79 = arith.constant 0 : index
    %240 = vector.load %arg12[%c0_77, %c6_78, %c0_79] : memref<2x8x128xf32, #tpu.memory_space<vmem>>, vector<2x1x128xf32>
    tpu.vector_store %arg12[%c0_77, %c6_78, %c0_79], %239 {strides = array<i32>} : memref<2x8x128xf32, #tpu.memory_space<vmem>>, vector<2x1x128xf32>,
    %c0_80 = arith.constant 0 : index
    %c7 = arith.constant 7 : index
    %c0_81 = arith.constant 0 : index
    %241 = vector.load %arg11[%c0_80, %c7, %c0_81] : memref<2x8x384xf32, #tpu.memory_space<vmem>>, vector<2x1x384xf32>
    %242 = vector.shape_cast %241 : vector<2x1x384xf32> to vector<2x384xf32>
    %cst_82 = arith.constant dense<0.000000e+00> : vector<2x384xf32>
    %243 = tpu.matmul %238, %12, %cst_82 {dimension_numbers = #tpu.dot_dimension_numbers<[1], [0], [0], [1], [0, 0, 1, 1], [], []>} : vector<2x128xf32>, vector<128x384xf32>, vector<2x384xf32> -> vector<2x384xf32>
    %244 = vector.extract_strided_slice %242 {offsets = [0, 0], sizes = [2, 128], strides = [1, 1]} : vector<2x384xf32> to vector<2x128xf32>
    %245 = vector.extract_strided_slice %243 {offsets = [0, 0], sizes = [2, 128], strides = [1, 1]} : vector<2x384xf32> to vector<2x128xf32>
    %246 = arith.addf %244, %245 : vector<2x128xf32>
    %247 = arith.negf %246 : vector<2x128xf32>
    %248 = math.exp %247 : vector<2x128xf32>
    %cst_83 = arith.constant 1.000000e+00 : f32
    %249 = vector.broadcast %cst_83 : f32 to vector<2x128xf32>
    %250 = arith.addf %249, %248 : vector<2x128xf32>
    %251 = arith.divf %249, %250 : vector<2x128xf32>
    %252 = vector.extract_strided_slice %242 {offsets = [0, 128], sizes = [2, 128], strides = [1, 1]} : vector<2x384xf32> to vector<2x128xf32>
    %253 = vector.extract_strided_slice %243 {offsets = [0, 128], sizes = [2, 128], strides = [1, 1]} : vector<2x384xf32> to vector<2x128xf32>
    %254 = arith.addf %252, %253 : vector<2x128xf32>
    %255 = arith.negf %254 : vector<2x128xf32>
    %256 = math.exp %255 : vector<2x128xf32>
    %cst_84 = arith.constant 1.000000e+00 : f32
    %257 = vector.broadcast %cst_84 : f32 to vector<2x128xf32>
    %258 = arith.addf %257, %256 : vector<2x128xf32>
    %259 = arith.divf %257, %258 : vector<2x128xf32>
    %260 = vector.extract_strided_slice %242 {offsets = [0, 256], sizes = [2, 128], strides = [1, 1]} : vector<2x384xf32> to vector<2x128xf32>
    %261 = vector.extract_strided_slice %243 {offsets = [0, 256], sizes = [2, 128], strides = [1, 1]} : vector<2x384xf32> to vector<2x128xf32>
    %262 = arith.addf %261, %15 : vector<2x128xf32>
    %263 = arith.mulf %251, %262 : vector<2x128xf32>
    %264 = arith.addf %260, %263 : vector<2x128xf32>
    %265 = math.tanh %264 : vector<2x128xf32>
    %cst_85 = arith.constant 1.000000e+00 : f32
    %266 = vector.broadcast %cst_85 : f32 to vector<2x128xf32>
    %267 = arith.subf %266, %259 : vector<2x128xf32>
    %268 = arith.mulf %267, %265 : vector<2x128xf32>
    %269 = arith.mulf %259, %238 : vector<2x128xf32>
    %270 = arith.addf %268, %269 : vector<2x128xf32>
    %271 = vector.shape_cast %270 : vector<2x128xf32> to vector<2x1x128xf32>
    %c0_86 = arith.constant 0 : index
    %c7_87 = arith.constant 7 : index
    %c0_88 = arith.constant 0 : index
    %272 = vector.load %arg12[%c0_86, %c7_87, %c0_88] : memref<2x8x128xf32, #tpu.memory_space<vmem>>, vector<2x1x128xf32>
    tpu.vector_store %arg12[%c0_86, %c7_87, %c0_88], %271 {strides = array<i32>} : memref<2x8x128xf32, #tpu.memory_space<vmem>>, vector<2x1x128xf32>,
    %c0_89 = arith.constant 0 : index
    %c0_90 = arith.constant 0 : index
    %273 = vector.load %arg13[%c0_89, %c0_90] : memref<2x128xf32, #tpu.memory_space<vmem>>, vector<2x128xf32>
    tpu.vector_store %arg13[%c0_89, %c0_90], %270 {strides = array<i32>} : memref<2x128xf32, #tpu.memory_space<vmem>>, vector<2x128xf32>,
    %c0_91 = arith.constant 0 : index
    %c0_92 = arith.constant 0 : index
    %274 = vector.load %arg10[%c0_91, %c0_92] : memref<2x128xf32, #tpu.memory_space<vmem>>, vector<2x128xf32>
    tpu.vector_store %arg10[%c0_91, %c0_92], %270 {strides = array<i32>} : memref<2x128xf32, #tpu.memory_space<vmem>>, vector<2x128xf32>,
    %c0_93 = arith.constant 0 : index
    %c0_94 = arith.constant 0 : index
    %c0_95 = arith.constant 0 : index
    %275 = vector.load %arg12[%c0_93, %c0_94, %c0_95] : memref<2x8x128xf32, #tpu.memory_space<vmem>>, vector<2x8x128xf32>
    %276 = vector.shape_cast %275 : vector<2x8x128xf32> to vector<16x128xf32>
    %c0_96 = arith.constant 0 : index
    %c0_97 = arith.constant 0 : index
    %277 = vector.load %arg6[%c0_96, %c0_97] : memref<128x4xf32, #tpu.memory_space<vmem>>, vector<128x4xf32>
    %cst_98 = arith.constant dense<0.000000e+00> : vector<16x4xf32>
    %278 = tpu.matmul %276, %277, %cst_98 {dimension_numbers = #tpu.dot_dimension_numbers<[1], [0], [0], [1], [0, 0, 1, 1], [], []>} : vector<16x128xf32>, vector<128x4xf32>, vector<16x4xf32> -> vector<16x4xf32>
    %c0_99 = arith.constant 0 : index
    %c0_100 = arith.constant 0 : index
    %279 = vector.load %arg7[%c0_99, %c0_100] : memref<1x4xf32, #tpu.memory_space<vmem>>, vector<1x4xf32>
    %280 = vector.broadcast %279 : vector<1x4xf32> to vector<16x4xf32>
    %281 = arith.addf %278, %280 : vector<16x4xf32>
    %282 = vector.shape_cast %281 : vector<16x4xf32> to vector<2x8x4xf32>
    %c0_101 = arith.constant 0 : index
    %c0_102 = arith.constant 0 : index
    %c0_103 = arith.constant 0 : index
    %283 = vector.load %arg9[%c0_101, %c0_102, %c0_103] : memref<2x8x4xf32, #tpu.memory_space<vmem>>, vector<2x8x4xf32>
    tpu.vector_store %arg9[%c0_101, %c0_102, %c0_103], %282 {strides = array<i32>} : memref<2x8x4xf32, #tpu.memory_space<vmem>>, vector<2x8x4xf32>,
    return
  }
  func.func @transform_0(%arg0: i32) -> (i32, i32, i32) {
    %c0_i32 = arith.constant 0 : i32
    %c0_i32_0 = arith.constant 0 : i32
    %c0_i32_1 = arith.constant 0 : i32
    return %c0_i32, %arg0, %c0_i32_0 : i32, i32, i32
  }
  func.func @transform_1(%arg0: i32) -> (i32, i32) {
    %c0_i32 = arith.constant 0 : i32
    %c0_i32_0 = arith.constant 0 : i32
    %c0_i32_1 = arith.constant 0 : i32
    return %c0_i32, %c0_i32_0 : i32, i32
  }
  func.func @transform_2(%arg0: i32) -> (i32, i32) {
    %c0_i32 = arith.constant 0 : i32
    %c0_i32_0 = arith.constant 0 : i32
    %c0_i32_1 = arith.constant 0 : i32
    return %c0_i32, %c0_i32_0 : i32, i32
  }
  func.func @transform_3(%arg0: i32) -> (i32, i32) {
    %c0_i32 = arith.constant 0 : i32
    %c0_i32_0 = arith.constant 0 : i32
    %c0_i32_1 = arith.constant 0 : i32
    return %c0_i32, %c0_i32_0 : i32, i32
  }
  func.func @transform_4(%arg0: i32) -> (i32, i32) {
    %c0_i32 = arith.constant 0 : i32
    %c0_i32_0 = arith.constant 0 : i32
    %c0_i32_1 = arith.constant 0 : i32
    return %c0_i32, %c0_i32_0 : i32, i32
  }
  func.func @transform_5(%arg0: i32) -> (i32, i32) {
    %c0_i32 = arith.constant 0 : i32
    %c0_i32_0 = arith.constant 0 : i32
    %c0_i32_1 = arith.constant 0 : i32
    return %c0_i32, %c0_i32_0 : i32, i32
  }
  func.func @transform_6(%arg0: i32) -> (i32, i32) {
    %c0_i32 = arith.constant 0 : i32
    %c0_i32_0 = arith.constant 0 : i32
    %c0_i32_1 = arith.constant 0 : i32
    return %c0_i32, %c0_i32_0 : i32, i32
  }
  func.func @transform_7(%arg0: i32) -> (i32, i32) {
    %c0_i32 = arith.constant 0 : i32
    %c0_i32_0 = arith.constant 0 : i32
    %c0_i32_1 = arith.constant 0 : i32
    return %c0_i32, %c0_i32_0 : i32, i32
  }
  func.func @transform_8(%arg0: i32) -> (i32, i32, i32) {
    %c0_i32 = arith.constant 0 : i32
    %c0_i32_0 = arith.constant 0 : i32
    %c0_i32_1 = arith.constant 0 : i32
    return %c0_i32, %arg0, %c0_i32_0 : i32, i32, i32
  }
  func.func @transform_9(%arg0: i32) -> (i32, i32) {
    %c0_i32 = arith.constant 0 : i32
    %c0_i32_0 = arith.constant 0 : i32
    %c0_i32_1 = arith.constant 0 : i32
    return %c0_i32, %c0_i32_0 : i32, i32
  }
}

</mosaic_0001>

<bundles_post_ra>
// kernel: four_dssm_forward.1
= control target key start
LH: loop header
LB: loop body
LE: loop exit
PB: predicated region body
PF: predicated region fallthrough
CT: control target
= control target key end

     0   :  { %v4856_v3 = vmov 0.0   ;;  %vm68_vm0 = vcmask 1043456   ;;  %vm61_vm1 = vcmask 31744   ;;  %vm3503_vm2 = vmmov 0   ;;  %s4846_s2 = inlined_call_operand.vmem [shape: f32[128,384], index: 2, kind: input, shape index: {}]   ;;  %s4847_s1 = inlined_call_operand.vmem [shape: f32[4,384], index: 1, kind: input, shape index: {}]   ;;  %s4848_s0 = inlined_call_operand.vmem [shape: f32[2,8,4], index: 0, kind: input, shape index: {}]   ;;  %s4849_s7 = inlined_call_operand.vmem [shape: f32[2,128], index: 7, kind: input, shape index: {}]   ;;  %s4850_s3 = inlined_call_operand.vmem [shape: f32[1,384], index: 3, kind: input, shape index: {}]   ;;  %s4851_s4 = inlined_call_operand.vmem [shape: f32[1,128], index: 4, kind: input, shape index: {}]   ;;  %s4852_s5 = inlined_call_operand.vmem [shape: f32[128,4], index: 5, kind: input, shape index: {}]   ;;  %s4853_s9 = inlined_call_operand.vmem [shape: f32[2,128], index: 9, kind: output, shape index: {1}]   ;;  %s4854_s6 = inlined_call_operand.vmem [shape: f32[1,4], index: 6, kind: input, shape index: {}]   ;;  %s4855_s8 = inlined_call_operand.vmem [shape: f32[2,8,4], index: 8, kind: output, shape index: {0}]  }
   0x1   :  { %v3558_v0 = vld [vmem:[%s4846_s2 + $0x170] sm:$0xff]  ;;  %v3563_v1 = vld [vmem:[%s4846_s2 + $0x168] sm:$0xff]  ;;  %v3568_v2 = vld [vmem:[%s4846_s2 + $0x158] sm:$0xff]  ;;  %139 = vmatprep.mubr.f32.mxu1 %v4856_v3  ;;  %356 = vmatprep.mubr.f32.mxu0 %v4856_v3  ;;  %v43_v56 = vlaneseq }
   0x2   :  { %4897 = vst [vmem:[#allocation5_spill] sm:$0xff] %v3558_v0  ;;  %292 = vmatprep.subr.mxu0 %v3558_v0  ;;  %v3576_v4 = vld [vmem:[%s4846_s2 + $0x150] sm:$0xff]  ;;  %v3582_v5 = vld [vmem:[%s4846_s2 + $0x140] sm:$0xff]  ;;  %v3591_v7 = vld [vmem:[%s4846_s2 + $0x138] sm:$0xff] }
   0x3   :  { %293 = vmatpush1.msra.mxu0 %v3563_v1  ;;  %v39_v6 = vld [vmem:[%s4847_s1] sm:$0xff]  ;;  %v3597_v9 = vld [vmem:[%s4846_s2 + $0x128] sm:$0xff]  ;;  %v3614_v12 = vld [vmem:[%s4846_s2 + $0x110] sm:$0xff]  ;;  %v44_v57 = vshrl.u32 %v43_v56, 7 }
   0x4   :  { %294 = vmatprep.subr.mxu0 %v3568_v2  ;;  %v60_v8 = vcombine.high %v39_v6, %v39_v6  ;;  %v37_v10 = vld [vmem:[%s4848_s0] sm:$0xff]  ;;  %v40_v13 = vld [vmem:[%s4847_s1 + $0x8] sm:$0xf]  ;;  %v3630_v15 = vld [vmem:[%s4846_s2 + $0xf8] sm:$0xff] }
   0x5   :  { %295 = vmatpush1.msra.mxu0 %v3576_v4  ;;  %v3607_v11 = vld [vmem:[%s4846_s2 + $0x120] sm:$0xff]  ;;  %v3624_v14 = vld [vmem:[%s4846_s2 + $0x108] sm:$0xff]  ;;  %v3640_v17 = vld [vmem:[%s4846_s2 + $0xf0] sm:$0xff]  ;;  %v45_v58 = vsub.s32 0, %v44_v57  ;;  %v49_v60 = vsub.s32 1, %v44_v57 }
   0x6   :  { %296 = vmatprep.subr.mxu0 %v3582_v5  ;;  %2769 = vmatprep.subr.msk.mxu1 %vm68_vm0, %v60_v8  ;;  %v38_v16 = vld [vmem:[%s4848_s0 + $0x8] sm:$0xff]  ;;  %v3647_v18 = vld [vmem:[%s4846_s2 + $0xe0] sm:$0xff]  ;;  %v3655_v19 = vld [vmem:[%s4846_s2 + $0xd8] sm:$0xff] }
   0x7   :  { %297 = vmatpush1.msra.mxu0 %v3591_v7  ;;  %2770 = vmatpush1.msk.msra.mxu1 %vm68_vm0, %v39_v6  ;;  %v3661_v20 = vld [vmem:[%s4846_s2 + $0xc8] sm:$0xff]  ;;  %v35_v21 = vld [vmem:[%s4849_s7] sm:$0x3]  ;;  %v3677_v23 = vld [vmem:[%s4846_s2 + $0x178] sm:$0xff] }
   0x8   :  { %298 = vmatprep.subr.mxu0 %v3597_v9  ;;  %2771 = vmatmul.mubr.msk.f32.vlgmr.msra.gmra.mxu1 %vm61_vm1, %v37_v10  ;;  %v3671_v22 = vld [vmem:[%s4846_s2 + $0xc0] sm:$0xff]  ;;  %36 = vst [vmem:[#allocation4] sm:$0x3] %v35_v21  ;;  %v3683_v24 = vld [vmem:[%s4846_s2 + $0xb0] sm:$0xff]  ;;  %v3690_v25 = vld [vmem:[%s4846_s2 + $0xa8] sm:$0xff] }
   0x9   :  { %299 = vmatpush1.msra.mxu0 %v3607_v11  ;;  %145 = vmatprep.mubr.f32.mxu1 %v4856_v3  ;;  %v3695_v26 = vld [vmem:[%s4846_s2 + $0x160] sm:$0xff]  ;;  %v3701_v27 = vld [vmem:[%s4846_s2 + $0x98] sm:$0xff]  ;;  %v3708_v28 = vld [vmem:[%s4846_s2 + $0x90] sm:$0xff] }
   0xa   :  { %300 = vmatprep.subr.mxu0 %v3614_v12  ;;  %2969 = vmatprep.subr.msk.mxu1 %vm68_vm0, %v40_v13  ;;  %v3714_v29 = vld [vmem:[%s4846_s2 + $0x148] sm:$0xff]  ;;  %v3720_v30 = vld [vmem:[%s4846_s2 + $0x80] sm:$0xff]  ;;  %v3727_v31 = vld [vmem:[%s4846_s2 + $0x78] sm:$0xff] }
   0xb   :  { %301 = vmatpush1.msra.mxu0 %v3624_v14  ;;  %2970 = vmatpush3.msk.msra.mxu1 %vm68_vm0, %v40_v13  ;;  %v3733_v32 = vld [vmem:[%s4846_s2 + $0x130] sm:$0xff]  ;;  %v3739_v33 = vld [vmem:[%s4846_s2 + $0x68] sm:$0xff]  ;;  %v3746_v34 = vld [vmem:[%s4846_s2 + $0x60] sm:$0xff]  ;;  %v53_v13 = vsub.s32 2, %v44_v57 }
   0xc   :  { %302 = vmatprep.subr.mxu0 %v3630_v15  ;;  %2772 = vmatmul.mubr.msk.f32.gmra.mxu1 %vm61_vm1, %v38_v16  ;;  %v3752_v35 = vld [vmem:[%s4846_s2 + $0x118] sm:$0xff]  ;;  %v3758_v36 = vld [vmem:[%s4846_s2 + $0x50] sm:$0xff]  ;;  %v3765_v37 = vld [vmem:[%s4846_s2 + $0x48] sm:$0xff] }
   0xd   :  { %303 = vmatpush1.msra.mxu0 %v3640_v17  ;;  %2971 = vmatprep.mubr.msk.f32.mxu1 %vm61_vm1, %v37_v10  ;;  %v3771_v38 = vld [vmem:[%s4846_s2 + $0x100] sm:$0xff]  ;;  %v3777_v39 = vld [vmem:[%s4846_s2 + $0x38] sm:$0xff]  ;;  %v3784_v40 = vld [vmem:[%s4846_s2 + $0x30] sm:$0xff] }
   0xe   :  { %304 = vmatprep.subr.mxu0 %v3647_v18  ;;  %2974 = vmatprep.subr.mxu1 %v4856_v3  ;;  %4898 = vst [vmem:[#allocation6_spill] sm:$0xff] %v3777_v39  ;;  %4899 = vst [vmem:[#allocation7_spill] sm:$0xff] %v3784_v40  ;;  %v3790_v41 = vld [vmem:[%s4846_s2 + $0xe8] sm:$0xff]  ;;  %v3796_v42 = vld [vmem:[%s4846_s2 + $0x20] sm:$0xff] }
   0xf   :  { %305 = vmatpush1.msra.mxu0 %v3655_v19  ;;  %4900 = vst [vmem:[#allocation8_spill] sm:$0xff] %v3796_v42  ;;  %v3803_v43 = vld [vmem:[%s4846_s2 + $0x18] sm:$0xff]  ;;  %v3809_v44 = vld [vmem:[%s4846_s2 + $0xd0] sm:$0xff]  ;;  %v3815_v45 = vld [vmem:[%s4846_s2 + $0x8] sm:$0xff] }
  0x10   :  { %306 = vmatprep.subr.mxu0 %v3661_v20  ;;  %2972 = vmatmul.mubr.msk.f32.vlgmr.msra.gmra.mxu1 %vm61_vm1, %v38_v16  ;;  %4901 = vst [vmem:[#allocation9_spill] sm:$0xff] %v3803_v43  ;;  %4902 = vst [vmem:[#allocation10_spill] sm:$0xff] %v3815_v45  ;;  %v3822_v46 = vld [vmem:[%s4846_s2] sm:$0xff]  ;;  %v3828_v47 = vld [vmem:[%s4846_s2 + $0xb8] sm:$0xff] }
  0x11   :  { %307 = vmatpush1.msra.mxu0 %v3671_v22  ;;  %2975 = vmatpush3.msra.mxu1 %v3677_v23  ;;  %4903 = vst [vmem:[#allocation11_spill] sm:$0xff] %v3822_v46  ;;  %v3831_v48 = vld [vmem:[#allocation4] sm:$0x3]  ;;  %v3848_v50 = vld [vmem:[%s4846_s2 + $0x88] sm:$0xff]  ;;  %v3857_v51 = vld [vmem:[%s4846_s2 + $0x70] sm:$0xff] }
  0x12   :  { %308 = vmatprep.subr.mxu0 %v3683_v24  ;;  %2976 = vmatprep.subr.mxu1 %v4856_v3  ;;  %v3839_v49 = vld [vmem:[%s4846_s2 + $0xa0] sm:$0xff]  ;;  %v3866_v52 = vld [vmem:[%s4846_s2 + $0x58] sm:$0xff]  ;;  %v3884_v54 = vld [vmem:[%s4846_s2 + $0x28] sm:$0xff] }
  0x13   :  { %309 = vmatpush1.msra.mxu0 %v3690_v25  ;;  %2977 = vmatpush3.msra.mxu1 %v3695_v26  ;;  %v3875_v53 = vld [vmem:[%s4846_s2 + $0x40] sm:$0xff]  ;;  %4905 = vst [vmem:[#allocation13_spill] sm:$0xff] %v3884_v54  ;;  %v3893_v55 = vld [vmem:[%s4846_s2 + $0x10] sm:$0xff] }
  0x14   :  { %310 = vmatprep.subr.mxu0 %v3701_v27  ;;  %2978 = vmatprep.subr.mxu1 %v4856_v3  ;;  %4904 = vst [vmem:[#allocation12_spill] sm:$0xff] %v3875_v53  ;;  %4906 = vst [vmem:[#allocation14_spill] sm:$0xff] %v3893_v55  ;;  %v41_v59 = vld [vmem:[%s4850_s3] sm:$0x7] }
  0x15   :  { %311 = vmatpush1.msra.mxu0 %v3708_v28  ;;  %2979 = vmatpush3.msra.mxu1 %v3714_v29  ;;  %v46_v61 = vrot.slane %v41_v59, %v45_v58  ;;  %v50_v62 = vrot.slane %v41_v59, %v49_v60  ;;  %v3504_v60 = vmov 1966171168  }
  0x16   :  { %312 = vmatprep.subr.mxu0 %v3720_v30  ;;  %2980 = vmatprep.subr.mxu1 %v4856_v3 }
  0x17   :  { %313 = vmatpush1.msra.mxu0 %v3727_v31  ;;  %2981 = vmatpush3.msra.mxu1 %v3733_v32 }
  0x18   :  { %314 = vmatprep.subr.mxu0 %v3739_v33  ;;  %2982 = vmatprep.subr.mxu1 %v4856_v3 }
  0x19   :  { %315 = vmatpush1.msra.mxu0 %v3746_v34  ;;  %2983 = vmatpush3.msra.mxu1 %v3752_v35 }
  0x1a   :  { %316 = vmatprep.subr.mxu0 %v3758_v36  ;;  %2984 = vmatprep.subr.mxu1 %v4856_v3 }
  0x1b   :  { %317 = vmatpush1.msra.mxu0 %v3765_v37  ;;  %2985 = vmatpush3.msra.mxu1 %v3771_v38 }
  0x1c   :  { %318 = vmatprep.subr.mxu0 %v3777_v39  ;;  %2986 = vmatprep.subr.mxu1 %v4856_v3 }
  0x1d   :  { %319 = vmatpush1.msra.mxu0 %v3784_v40  ;;  %2987 = vmatpush3.msra.mxu1 %v3790_v41 }
  0x1e   :  { %320 = vmatprep.subr.mxu0 %v3796_v42  ;;  %2988 = vmatprep.subr.mxu1 %v4856_v3 }
  0x1f   :  { %321 = vmatpush1.msra.mxu0 %v3803_v43  ;;  %2989 = vmatpush3.msra.mxu1 %v3809_v44 }
  0x20   :  { %322 = vmatprep.subr.mxu0 %v3815_v45  ;;  %2990 = vmatprep.subr.mxu1 %v4856_v3 }
  0x21   :  { %323 = vmatpush1.msra.mxu0 %v3822_v46  ;;  %2991 = vmatpush3.msra.mxu1 %v3828_v47 }
  0x22   :  { %357 = vmatmul.mubr.f32.vlgmr.msra.gmra.mxu0 %v3831_v48  ;;  %2992 = vmatprep.subr.mxu1 %v4856_v3 }
  0x23   :  { %2993 = vmatpush3.msra.mxu1 %v3839_v49  ;;  %3006 = vmatprep.mubr.msk.f32.mxu1 %vm3503_vm2, %v4856_v3 }
  0x24   :  { %2994 = vmatprep.subr.mxu1 %v4856_v3  ;;  %610 = vmatprep.subr.mxu0 %v3558_v0 }
  0x25   :  { %2995 = vmatpush3.msra.mxu1 %v3848_v50  ;;  %611 = vmatpush1.msra.mxu0 %v3563_v1 }
  0x26   :  { %2996 = vmatprep.subr.mxu1 %v4856_v3  ;;  %612 = vmatprep.subr.mxu0 %v3568_v2 }
  0x27   :  { %2997 = vmatpush3.msra.mxu1 %v3857_v51  ;;  %613 = vmatpush1.msra.mxu0 %v3576_v4 }
  0x28   :  { %2998 = vmatprep.subr.mxu1 %v4856_v3  ;;  %614 = vmatprep.subr.mxu0 %v3582_v5 }
  0x29   :  { %2999 = vmatpush3.msra.mxu1 %v3866_v52  ;;  %615 = vmatpush1.msra.mxu0 %v3591_v7 }
  0x2a   :  { %3000 = vmatprep.subr.mxu1 %v4856_v3  ;;  %616 = vmatprep.subr.mxu0 %v3597_v9 }
  0x2b   :  { %3001 = vmatpush3.msra.mxu1 %v3875_v53  ;;  %617 = vmatpush1.msra.mxu0 %v3607_v11 }
  0x2c   :  { %3002 = vmatprep.subr.mxu1 %v4856_v3  ;;  %618 = vmatprep.subr.mxu0 %v3614_v12 }
  0x2d   :  { %3003 = vmatpush3.msra.mxu1 %v3884_v54  ;;  %619 = vmatpush1.msra.mxu0 %v3624_v14 }
  0x2e   :  { %3004 = vmatprep.subr.mxu1 %v4856_v3  ;;  %620 = vmatprep.subr.mxu0 %v3630_v15 }
  0x2f   :  { %3005 = vmatpush3.msra.mxu1 %v3893_v55  ;;  %621 = vmatpush1.msra.mxu0 %v3640_v17 }
  0x30   :  { %3007 = vmatmul.mubr.f32.vlgmr.msra.gmra.mxu1 %v3831_v48  ;;  %3009 = vmatprep.subr.mxu1 %v4856_v3 }
  0x31   :  { %3010 = vmatpush3.msra.mxu1 %v3677_v23  ;;  %622 = vmatprep.subr.mxu0 %v3647_v18 }
  0x32   :  { %3011 = vmatprep.subr.mxu1 %v4856_v3  ;;  %623 = vmatpush1.msra.mxu0 %v3655_v19 }
  0x33   :  { %3012 = vmatpush3.msra.mxu1 %v3695_v26  ;;  %624 = vmatprep.subr.mxu0 %v3661_v20 }
  0x34   :  { %3013 = vmatprep.subr.mxu1 %v4856_v3  ;;  %625 = vmatpush1.msra.mxu0 %v3671_v22 }
  0x35   :  { %3014 = vmatpush3.msra.mxu1 %v3714_v29  ;;  %626 = vmatprep.subr.mxu0 %v3683_v24 }
  0x36   :  { %3015 = vmatprep.subr.mxu1 %v4856_v3  ;;  %627 = vmatpush1.msra.mxu0 %v3690_v25 }
  0x37   :  { %3016 = vmatpush3.msra.mxu1 %v3733_v32  ;;  %628 = vmatprep.subr.mxu0 %v3701_v27 }
  0x38   :  { %3017 = vmatprep.subr.mxu1 %v4856_v3  ;;  %629 = vmatpush1.msra.mxu0 %v3708_v28 }
  0x39   :  { %3018 = vmatpush3.msra.mxu1 %v3752_v35  ;;  %630 = vmatprep.subr.mxu0 %v3720_v30 }
  0x3a   :  { %3019 = vmatprep.subr.mxu1 %v4856_v3  ;;  %631 = vmatpush1.msra.mxu0 %v3727_v31 }
  0x3b   :  { %3020 = vmatpush3.msra.mxu1 %v3771_v38  ;;  %632 = vmatprep.subr.mxu0 %v3739_v33 }
  0x3c   :  { %3021 = vmatprep.subr.mxu1 %v4856_v3  ;;  %633 = vmatpush1.msra.mxu0 %v3746_v34 }
  0x3d   :  { %3022 = vmatpush3.msra.mxu1 %v3790_v41  ;;  %634 = vmatprep.subr.mxu0 %v3758_v36 }
  0x3e   :  { %3023 = vmatprep.subr.mxu1 %v4856_v3  ;;  %635 = vmatpush1.msra.mxu0 %v3765_v37 }
  0x3f   :  { %3024 = vmatpush3.msra.mxu1 %v3809_v44  ;;  %636 = vmatprep.subr.mxu0 %v3777_v39 }
  0x40   :  { %3025 = vmatprep.subr.mxu1 %v4856_v3  ;;  %637 = vmatpush1.msra.mxu0 %v3784_v40 }
  0x41   :  { %3026 = vmatpush3.msra.mxu1 %v3828_v47  ;;  %638 = vmatprep.subr.mxu0 %v3796_v42 }
  0x42   :  { %3027 = vmatprep.subr.mxu1 %v4856_v3  ;;  %639 = vmatpush1.msra.mxu0 %v3803_v43 }
  0x43   :  { %3028 = vmatpush3.msra.mxu1 %v3839_v49  ;;  %640 = vmatprep.subr.mxu0 %v3815_v45 }
  0x44   :  { %3029 = vmatprep.subr.mxu1 %v4856_v3  ;;  %641 = vmatpush1.msra.mxu0 %v3822_v46 }
  0x45   :  { %3030 = vmatpush3.msra.mxu1 %v3848_v50  ;;  %674 = vmatprep.mubr.f32.mxu0 %v4856_v3 }
  0x46   :  { %3031 = vmatprep.subr.mxu1 %v4856_v3  ;;  %3041 = vmatprep.mubr.msk.f32.mxu1 %vm3503_vm2, %v4856_v3 }
  0x47   :  { %3032 = vmatpush3.msra.mxu1 %v3857_v51  ;;  %903 = vmatprep.subr.mxu0 %v3558_v0  ;;  %v54_v0 = vrot.slane %v41_v59, %v53_v13 }
  0x48   :  { %3033 = vmatprep.subr.mxu1 %v4856_v3 }
  0x49   :  { %3034 = vmatpush3.msra.mxu1 %v3866_v52 }
  0x4a   :  { %3035 = vmatprep.subr.mxu1 %v4856_v3 }
  0x4b   :  { %3036 = vmatpush3.msra.mxu1 %v3875_v53 }
  0x4c   :  { %3037 = vmatprep.subr.mxu1 %v4856_v3 }
  0x4d   :  { %3038 = vmatpush3.msra.mxu1 %v3884_v54 }
  0x4e   :  { %3039 = vmatprep.subr.mxu1 %v4856_v3 }
  0x4f   :  { %3040 = vmatpush3.msra.mxu1 %v3893_v55 }
  0x50   :  { %3044 = vmatprep.subr.mxu1 %v4856_v3 }
  0xc8   :  { %v141_v63 = vpop.f32.mrf.mxu1 }
  0xc9   :  { %v142_v6 = vadd.f32 %v141_v63, %v46_v61  ;;  %v435_v63 = vunpack.c.l.s4 %v3504_v60 }
  0xca   :  { %v143_v8 = vpop.f32.mrf.mxu1 }
  0xcb   :  { %227 = vst [vmem:[#allocation2] sm:$0xff] %v142_v6  ;;  %v144_v10 = vadd.f32 %v143_v8, %v50_v62  ;;  %v436_v54 = vunpack.c.0.s8 %v435_v63 }
  0xcc   :  { %v147_v16 = vpop.f32.mrf.mxu1 }
  0xcd   :  { %228 = vst [vmem:[#allocation2 + $0x8] sm:$0xff] %v144_v10  ;;  %v148_v21 = vadd.f32 %v147_v16, %v46_v61  ;;  %v3963_v6 = vsub.s32 %v436_v54, %v44_v57 }
  0xce   :  { %v149_v3 = vpop.f32.mrf.mxu1 }
  0xcf   :  { %230 = vst [vmem:[#allocation2 + $0x18] sm:$0xff] %v148_v21  ;;  %v150_v56 = vadd.f32 %v149_v3, %v50_v62 }
  0xd0   :  { %v2973_v55 = vpop.f32.mrf.mxu1 }
  0xd1   :  { %231 = vst [vmem:[#allocation2 + $0x20] sm:$0xff] %v150_v56  ;;  %v224_v46 = vadd.f32 %v2973_v55, %v54_v0 }
  0xd2   :  { %v218_v45 = vpop.f32.mrf.mxu1 }
  0xd3   :  { %232 = vst [vmem:[#allocation2 + $0x28] sm:$0xff] %v224_v46  ;;  %v219_v58 = vadd.f32 %v218_v45, %v54_v0 }
  0xd5   :  { %229 = vst [vmem:[#allocation2 + $0x10] sm:$0xff] %v219_v58 }
  0xda   :  { %v291_v45 = vld [vmem:[#allocation2 + $0x18] ss:$8 sm:$0x7] }
  0xdb   :  { %v475_v60 = vrot.slane %v291_v45, 1 }
  0xdc   :  { %v289_v62 = vld [vmem:[#allocation2] ss:$8 sm:$0x7] }
  0xdd   :  { %v474_v56 = vrot.slane %v289_v62, 1 }
  0xe2   :  { %v358_v8 = vpop.f32.mrf.mxu0 }
  0xe3   :  { %v440_v10 = vrot.slane %v358_v8, %v3963_v6 }
  0xe4   :  { %v360_v61 = vpop.f32.mrf.mxu0 }
  0xe5   :  { %v441_v16 = vcombine.high %v440_v10, %v440_v10  ;;  %v448_v3 = vrot.slane %v440_v10, %v3963_v6  ;;  %v485_v59 = vrot.slane %v360_v61, %v3963_v6 }
  0xe7   :  { %v455_v55 = vrot.slane %v441_v16, %v3963_v6  ;;  %v458_v46 = vadd.f32 %v448_v3, %v289_v62  ;;  %v486_v0 = vcombine.high %v485_v59, %v485_v59  ;;  %v493_v54 = vrot.slane %v485_v59, %v3963_v6  ;;  %v3974_v59 = vld [vmem:[%s4851_s4] ss:$0 sm:$0xff] }
  0xe8   :  { %4907 = vst [vmem:[#allocation15_spill] sm:$0xff] %v3974_v59 }
  0xe9   :  { %v459_v13 = vadd.f32 %v455_v55, %v291_v45  ;;  %v2777_v21 = vmul.f32 -1.442695, %v458_v46  ;;  %v500_v58 = vrot.slane %v486_v0, %v3963_v6  ;;  %v503_v63 = vadd.f32 %v493_v54, %v474_v56 }
  0xeb   :  { %3293 = vpow2.f32 %v2777_v21  ;;  %v2778_v57 = vmul.f32 -1.442695, %v459_v13  ;;  %v504_v8 = vadd.f32 %v500_v58, %v475_v60  ;;  %v2779_v61 = vmul.f32 -1.442695, %v503_v63 }
  0xed   :  { %3295 = vpow2.f32 %v2778_v57  ;;  %v2780_v16 = vmul.f32 -1.442695, %v504_v8 }
  0xee   :  { %3297 = vpow2.f32 %v2779_v61  ;;  %v545_v61 = vrot.slane %v289_v62, 2 }
  0xef   :  { %3299 = vpow2.f32 %v2780_v16 }
  0xf0   :  { %v429_v10 = vpop.f32.mrf.mxu1 }
  0xf1   :  { %v517_v0 = vadd.f32 %v3974_v59, %v429_v10 }
  0xf2   :  { %v3008_v43 = vpop.f32.mrf.mxu1 }
  0xf3   :  { %v525_v21 = vrot.slane %v517_v0, %v3963_v6  ;;  %v564_v0 = vrot.slane %v3831_v48, %v3963_v6 }
  0xf5   :  { %v526_v43 = vcombine.high %v525_v21, %v525_v21  ;;  %v533_v58 = vrot.slane %v525_v21, %v3963_v6 }
  0xf7   :  { %v540_v63 = vrot.slane %v526_v43, %v3963_v6 }
  0xf8   :  { %v3294_v3 = vpop.eup %3293 }
  0xf9   :  { %v466_v55 = vadd.f32 1.0, %v3294_v3 }
  0xfa   :  { %v3296_v46 = vpop.eup %3295 }
  0xfb   :  { %v467_v13 = vadd.f32 1.0, %v3296_v46  ;;  %3301 = vrcp.f32 %v466_v55  ;;  %v3298_v54 = vpop.eup %3297  ;;  %v546_v55 = vrot.slane %v291_v45, 2 }
  0xfc   :  { %v3300_v57 = vpop.eup %3299  ;;  %v511_v56 = vadd.f32 1.0, %v3298_v54  ;;  %v565_v54 = vcombine.high %v564_v0, %v564_v0 }
  0xfd   :  { %3303 = vrcp.f32 %v467_v13  ;;  %v512_v60 = vadd.f32 1.0, %v3300_v57  ;;  %v572_v57 = vrot.slane %v564_v0, %v3963_v6  ;;  %v4909_v0 = vld [vmem:[#allocation9_spill] sm:$0xff] }
  0xfe   :  { %3305 = vrcp.f32 %v511_v56  ;;  %v579_v62 = vrot.slane %v565_v54, %v3963_v6  ;;  %v4910_v54 = vld [vmem:[#allocation13_spill] sm:$0xff] }
  0xff   :  { %3307 = vrcp.f32 %v512_v60 }
 0x108   :  { %v3302_v8 = vpop.eup %3301 }
 0x109   :  { %v543_v16 = vmul.f32 %v3302_v8, %v533_v58 }
 0x10a   :  { %v3304_v3 = vpop.eup %3303 }
 0x10b   :  { %v544_v10 = vmul.f32 %v3304_v3, %v540_v63  ;;  %v549_v46 = vadd.f32 %v545_v61, %v543_v16  ;;  %v3306_v21 = vpop.eup %3305 }
 0x10c   :  { %v3308_v43 = vpop.eup %3307  ;;  %v553_v56 = vsub.f32 1.0, %v3306_v21  ;;  %v582_v60 = vmul.f32 %v3306_v21, %v572_v57  ;;  %v4911_v21 = vld [vmem:[#allocation10_spill] sm:$0xff]  ;;  %v4912_v57 = vld [vmem:[#allocation11_spill] sm:$0xff] }
 0x10d   :  { %v550_v13 = vadd.f32 %v546_v55, %v544_v10  ;;  %3309 = vtanh.f32 %v549_v46  ;;  %v554_v8 = vsub.f32 1.0, %v3308_v43  ;;  %v583_v16 = vmul.f32 %v3308_v43, %v579_v62  ;;  %v4913_v43 = vld [vmem:[#allocation14_spill] sm:$0xff]  ;;  %v4914_v62 = vld [vmem:[#allocation5_spill] sm:$0xff] }
 0x10f   :  { %3311 = vtanh.f32 %v550_v13  ;;  %v4908_v13 = vmov 0.0  }
 0x11a   :  { %v3310_v58 = vpop.eup %3309 }
 0x11b   :  { %v555_v45 = vmul.f32 %v3310_v58, %v553_v56 }
 0x11c   :  { %v3312_v63 = vpop.eup %3311 }
 0x11d   :  { %v556_v61 = vmul.f32 %v3312_v63, %v554_v8  ;;  %v3984_v3 = vadd.f32 %v582_v60, %v555_v45 }
 0x11f   :  { %v3986_v55 = vadd.f32 %v583_v16, %v556_v61  ;;  %586 = vst [vmem:[#allocation3] sm:$0x1] %v3984_v3 }
 0x121   :  { %587 = vst [vmem:[#allocation3 + $0x8] sm:$0x1] %v3986_v55  ;;  %v594_v48 = vcombine.low %v3984_v3, %v3986_v55 }
 0x123   :  { %v601_v10 = vrot.slane %v594_v48, %v3963_v6  ;;  %v589_v48 = vld [vmem:[#allocation2 + $0x1] ss:$8 sm:$0x7] }
 0x125   :  { %v608_v46 = vrot.slane %v601_v10, %v3963_v6 }
 0x127   :  { %675 = vmatmul.mubr.f32.vlgmr.msra.gmra.mxu0 %v608_v46  ;;  %3042 = vmatmul.mubr.f32.vlgmr.msra.gmra.mxu1 %v608_v46 }
 0x128   :  { %904 = vmatpush1.msra.mxu0 %v3563_v1  ;;  %3045 = vmatpush3.msra.mxu1 %v3677_v23 }
 0x129   :  { %905 = vmatprep.subr.mxu0 %v3568_v2  ;;  %3046 = vmatprep.subr.mxu1 %v4908_v13 }
 0x12a   :  { %906 = vmatpush1.msra.mxu0 %v3576_v4  ;;  %3047 = vmatpush3.msra.mxu1 %v3695_v26 }
 0x12b   :  { %907 = vmatprep.subr.mxu0 %v3582_v5  ;;  %3048 = vmatprep.subr.mxu1 %v4908_v13 }
 0x12c   :  { %908 = vmatpush1.msra.mxu0 %v3591_v7  ;;  %3049 = vmatpush3.msra.mxu1 %v3714_v29 }
 0x12d   :  { %909 = vmatprep.subr.mxu0 %v3597_v9  ;;  %3050 = vmatprep.subr.mxu1 %v4908_v13 }
 0x12e   :  { %910 = vmatpush1.msra.mxu0 %v3607_v11  ;;  %3051 = vmatpush3.msra.mxu1 %v3733_v32 }
 0x12f   :  { %911 = vmatprep.subr.mxu0 %v3614_v12  ;;  %3052 = vmatprep.subr.mxu1 %v4908_v13 }
 0x130   :  { %912 = vmatpush1.msra.mxu0 %v3624_v14  ;;  %3053 = vmatpush3.msra.mxu1 %v3752_v35 }
 0x131   :  { %913 = vmatprep.subr.mxu0 %v3630_v15  ;;  %3054 = vmatprep.subr.mxu1 %v4908_v13 }
 0x132   :  { %914 = vmatpush1.msra.mxu0 %v3640_v17  ;;  %3055 = vmatpush3.msra.mxu1 %v3771_v38 }
 0x133   :  { %915 = vmatprep.subr.mxu0 %v3647_v18  ;;  %3056 = vmatprep.subr.mxu1 %v4908_v13 }
 0x134   :  { %916 = vmatpush1.msra.mxu0 %v3655_v19  ;;  %3057 = vmatpush3.msra.mxu1 %v3790_v41 }
 0x135   :  { %917 = vmatprep.subr.mxu0 %v3661_v20  ;;  %3058 = vmatprep.subr.mxu1 %v4908_v13 }
 0x136   :  { %918 = vmatpush1.msra.mxu0 %v3671_v22  ;;  %3059 = vmatpush3.msra.mxu1 %v3809_v44 }
 0x137   :  { %919 = vmatprep.subr.mxu0 %v3683_v24  ;;  %3060 = vmatprep.subr.mxu1 %v4908_v13 }
 0x138   :  { %920 = vmatpush1.msra.mxu0 %v3690_v25  ;;  %3061 = vmatpush3.msra.mxu1 %v3828_v47 }
 0x139   :  { %921 = vmatprep.subr.mxu0 %v3701_v27  ;;  %3062 = vmatprep.subr.mxu1 %v4908_v13 }
 0x13a   :  { %922 = vmatpush1.msra.mxu0 %v3708_v28  ;;  %3063 = vmatpush3.msra.mxu1 %v3839_v49 }
 0x13b   :  { %923 = vmatprep.subr.mxu0 %v3720_v30  ;;  %3064 = vmatprep.subr.mxu1 %v4908_v13 }
 0x13c   :  { %924 = vmatpush1.msra.mxu0 %v3727_v31  ;;  %3065 = vmatpush3.msra.mxu1 %v3848_v50 }
 0x13d   :  { %925 = vmatprep.subr.mxu0 %v3739_v33  ;;  %3066 = vmatprep.subr.mxu1 %v4908_v13 }
 0x13e   :  { %926 = vmatpush1.msra.mxu0 %v3746_v34  ;;  %3067 = vmatpush3.msra.mxu1 %v3857_v51 }
 0x13f   :  { %927 = vmatprep.subr.mxu0 %v3758_v36  ;;  %3068 = vmatprep.subr.mxu1 %v4908_v13 }
 0x140   :  { %928 = vmatpush1.msra.mxu0 %v3765_v37  ;;  %3069 = vmatpush3.msra.mxu1 %v3866_v52 }
 0x141   :  { %929 = vmatprep.subr.mxu0 %v3777_v39  ;;  %3070 = vmatprep.subr.mxu1 %v4908_v13 }
 0x142   :  { %930 = vmatpush1.msra.mxu0 %v3784_v40  ;;  %3071 = vmatpush3.msra.mxu1 %v3875_v53 }
 0x143   :  { %931 = vmatprep.subr.mxu0 %v3796_v42  ;;  %3072 = vmatprep.subr.mxu1 %v4908_v13 }
 0x144   :  { %932 = vmatpush1.msra.mxu0 %v4909_v0  ;;  %3073 = vmatpush3.msra.mxu1 %v4910_v54 }
 0x145   :  { %933 = vmatprep.subr.mxu0 %v4911_v21  ;;  %3074 = vmatprep.subr.mxu1 %v4908_v13 }
 0x146   :  { %934 = vmatpush1.msra.mxu0 %v4912_v57  ;;  %967 = vmatprep.mubr.f32.mxu0 %v4908_v13 }
 0x147   :  { %3075 = vmatpush3.msra.mxu1 %v4913_v43  ;;  %3076 = vmatprep.mubr.msk.f32.mxu1 %vm3503_vm2, %v4908_v13  ;;  %v591_v43 = vld [vmem:[#allocation2 + $0x19] ss:$8 sm:$0x7] }
 0x148   :  { %1196 = vmatprep.subr.mxu0 %v4914_v62  ;;  %3079 = vmatprep.subr.mxu1 %v4908_v13  ;;  %v793_v42 = vrot.slane %v591_v43, 1 }
 0x1e7   :  { %v676_v56 = vpop.f32.mrf.mxu0  ;;  %v747_v58 = vpop.f32.mrf.mxu1 }
 0x1e8   :  { %v758_v8 = vrot.slane %v676_v56, %v3963_v6  ;;  %v792_v56 = vrot.slane %v589_v48, 1 }
 0x1e9   :  { %v678_v45 = vpop.f32.mrf.mxu0  ;;  %v3043_v60 = vpop.f32.mrf.mxu1 }
 0x1ea   :  { %v759_v63 = vcombine.high %v758_v8, %v758_v8  ;;  %v766_v61 = vrot.slane %v758_v8, %v3963_v6  ;;  %v803_v16 = vrot.slane %v678_v45, %v3963_v6 }
 0x1ec   :  { %v773_v10 = vrot.slane %v759_v63, %v3963_v6  ;;  %v776_v46 = vadd.f32 %v766_v61, %v589_v48  ;;  %v804_v57 = vcombine.high %v803_v16, %v803_v16  ;;  %v811_v54 = vrot.slane %v803_v16, %v3963_v6 }
 0x1ee   :  { %v777_v62 = vadd.f32 %v773_v10, %v591_v43  ;;  %v2781_v21 = vmul.f32 -1.442695, %v776_v46  ;;  %v818_v60 = vrot.slane %v804_v57, %v3963_v6  ;;  %v821_v8 = vadd.f32 %v811_v54, %v792_v56 }
 0x1ef   :  { %v863_v56 = vrot.slane %v589_v48, 2 }
 0x1f0   :  { %3313 = vpow2.f32 %v2781_v21  ;;  %v2782_v0 = vmul.f32 -1.442695, %v777_v62  ;;  %v822_v53 = vadd.f32 %v818_v60, %v793_v42  ;;  %v2783_v45 = vmul.f32 -1.442695, %v821_v8 }
 0x1f1   :  { %v835_v21 = vadd.f32 %v3974_v59, %v747_v58  ;;  %v864_v8 = vrot.slane %v591_v43, 2 }
 0x1f2   :  { %3315 = vpow2.f32 %v2782_v0  ;;  %v2784_v40 = vmul.f32 -1.442695, %v822_v53 }
 0x1f3   :  { %3317 = vpow2.f32 %v2783_v45  ;;  %v843_v16 = vrot.slane %v835_v21, %v3963_v6 }
 0x1f4   :  { %3319 = vpow2.f32 %v2784_v40 }
 0x1f5   :  { %v844_v0 = vcombine.high %v843_v16, %v843_v16  ;;  %v851_v42 = vrot.slane %v843_v16, %v3963_v6 }
 0x1f7   :  { %v858_v40 = vrot.slane %v844_v0, %v3963_v6 }
 0x1fd   :  { %v3314_v63 = vpop.eup %3313 }
 0x1fe   :  { %v784_v61 = vadd.f32 1.0, %v3314_v63 }
 0x1ff   :  { %v3316_v39 = vpop.eup %3315 }
 0x200   :  { %v785_v10 = vadd.f32 1.0, %v3316_v39  ;;  %3321 = vrcp.f32 %v784_v61  ;;  %v3318_v46 = vpop.eup %3317 }
 0x201   :  { %v3320_v57 = vpop.eup %3319  ;;  %v829_v62 = vadd.f32 1.0, %v3318_v46 }
 0x202   :  { %3323 = vrcp.f32 %v785_v10  ;;  %v830_v54 = vadd.f32 1.0, %v3320_v57 }
 0x203   :  { %3325 = vrcp.f32 %v829_v62 }
 0x204   :  { %3327 = vrcp.f32 %v830_v54 }
 0x20d   :  { %v3322_v53 = vpop.eup %3321 }
 0x20e   :  { %v861_v60 = vmul.f32 %v3322_v53, %v851_v42 }
 0x20f   :  { %v3324_v39 = vpop.eup %3323 }
 0x210   :  { %v862_v45 = vmul.f32 %v3324_v39, %v858_v40  ;;  %v867_v63 = vadd.f32 %v863_v56, %v861_v60  ;;  %v3326_v61 = vpop.eup %3325 }
 0x211   :  { %v3328_v10 = vpop.eup %3327  ;;  %v871_v21 = vsub.f32 1.0, %v3326_v61  ;;  %v875_v48 = vmul.f32 %v3326_v61, %v3984_v3 }
 0x212   :  { %v868_v58 = vadd.f32 %v864_v8, %v862_v45  ;;  %3329 = vtanh.f32 %v867_v63  ;;  %v872_v16 = vsub.f32 1.0, %v3328_v10  ;;  %v876_v62 = vmul.f32 %v3328_v10, %v3986_v55 }
 0x214   :  { %3331 = vtanh.f32 %v868_v58 }
 0x21f   :  { %v3330_v46 = vpop.eup %3329 }
 0x220   :  { %v873_v57 = vmul.f32 %v3330_v46, %v871_v21 }
 0x221   :  { %v3332_v59 = vpop.eup %3331 }
 0x222   :  { %v874_v0 = vmul.f32 %v3332_v59, %v872_v16  ;;  %v4073_v42 = vadd.f32 %v875_v48, %v873_v57  ;;  %v4925_v59 = vld [vmem:[#allocation15_spill] sm:$0xff] }
 0x224   :  { %v4075_v43 = vadd.f32 %v876_v62, %v874_v0  ;;  %879 = vst [vmem:[#allocation3 + $0x1] sm:$0x1] %v4073_v42 }
 0x226   :  { %880 = vst [vmem:[#allocation3 + $0x9] sm:$0x1] %v4075_v43  ;;  %v887_v54 = vcombine.low %v4073_v42, %v4075_v43 }
 0x228   :  { %v894_v53 = vrot.slane %v887_v54, %v3963_v6 }
 0x22a   :  { %v901_v56 = vrot.slane %v894_v53, %v3963_v6 }
 0x22c   :  { %968 = vmatmul.mubr.f32.vlgmr.msra.gmra.mxu0 %v901_v56  ;;  %3077 = vmatmul.mubr.f32.vlgmr.msra.gmra.mxu1 %v901_v56 }
 0x22d   :  { %1197 = vmatpush1.msra.mxu0 %v3563_v1  ;;  %3080 = vmatpush3.msra.mxu1 %v3677_v23  ;;  %v4915_v1 = vld [vmem:[#allocation6_spill] sm:$0xff] }
 0x22e   :  { %1198 = vmatprep.subr.mxu0 %v3568_v2  ;;  %3081 = vmatprep.subr.mxu1 %v4908_v13  ;;  %v4916_v2 = vld [vmem:[#allocation7_spill] sm:$0xff] }
 0x22f   :  { %1199 = vmatpush1.msra.mxu0 %v3576_v4  ;;  %3082 = vmatpush3.msra.mxu1 %v3695_v26  ;;  %v4917_v4 = vld [vmem:[#allocation12_spill] sm:$0xff]  ;;  %v882_v26 = vld [vmem:[#allocation2 + $0x2] ss:$8 sm:$0x7] }
 0x230   :  { %1200 = vmatprep.subr.mxu0 %v3582_v5  ;;  %3083 = vmatprep.subr.mxu1 %v4908_v13  ;;  %v4918_v5 = vld [vmem:[#allocation8_spill] sm:$0xff]  ;;  %v1156_v61 = vrot.slane %v882_v26, 2 }
 0x231   :  { %1201 = vmatpush1.msra.mxu0 %v3591_v7  ;;  %3084 = vmatpush3.msra.mxu1 %v3714_v29  ;;  %v4919_v7 = vld [vmem:[#allocation9_spill] sm:$0xff] }
 0x232   :  { %1202 = vmatprep.subr.mxu0 %v3597_v9  ;;  %3085 = vmatprep.subr.mxu1 %v4908_v13  ;;  %v4920_v9 = vld [vmem:[#allocation13_spill] sm:$0xff] }
 0x233   :  { %1203 = vmatpush1.msra.mxu0 %v3607_v11  ;;  %3086 = vmatpush3.msra.mxu1 %v3733_v32  ;;  %v4921_v11 = vld [vmem:[#allocation10_spill] sm:$0xff] }
 0x234   :  { %1204 = vmatprep.subr.mxu0 %v3614_v12  ;;  %3087 = vmatprep.subr.mxu1 %v4908_v13  ;;  %v4922_v12 = vld [vmem:[#allocation11_spill] sm:$0xff]  ;;  %v884_v29 = vld [vmem:[#allocation2 + $0x1a] ss:$8 sm:$0x7] }
 0x235   :  { %1205 = vmatpush1.msra.mxu0 %v3624_v14  ;;  %3088 = vmatpush3.msra.mxu1 %v3752_v35  ;;  %v4923_v14 = vld [vmem:[#allocation14_spill] sm:$0xff]  ;;  %v1085_v35 = vrot.slane %v882_v26, 1  ;;  %v1157_v16 = vrot.slane %v884_v29, 2 }
 0x236   :  { %1206 = vmatprep.subr.mxu0 %v3630_v15  ;;  %3089 = vmatprep.subr.mxu1 %v4908_v13  ;;  %v4151_v15 = vld [vmem:[%s4846_s2 + $0x170] sm:$0xff] }
 0x237   :  { %1207 = vmatpush1.msra.mxu0 %v3640_v17  ;;  %3090 = vmatpush3.msra.mxu1 %v3771_v38  ;;  %4924 = vst [vmem:[#allocation5_spill] sm:$0xff] %v4151_v15 }
 0x238   :  { %1208 = vmatprep.subr.mxu0 %v3647_v18  ;;  %3091 = vmatprep.subr.mxu1 %v4908_v13 }
 0x239   :  { %1209 = vmatpush1.msra.mxu0 %v3655_v19  ;;  %3092 = vmatpush3.msra.mxu1 %v3790_v41 }
 0x23a   :  { %1210 = vmatprep.subr.mxu0 %v3661_v20  ;;  %3093 = vmatprep.subr.mxu1 %v4908_v13 }
 0x23b   :  { %1211 = vmatpush1.msra.mxu0 %v3671_v22  ;;  %3094 = vmatpush3.msra.mxu1 %v3809_v44 }
 0x23c   :  { %1212 = vmatprep.subr.mxu0 %v3683_v24  ;;  %3095 = vmatprep.subr.mxu1 %v4908_v13 }
 0x23d   :  { %1213 = vmatpush1.msra.mxu0 %v3690_v25  ;;  %3096 = vmatpush3.msra.mxu1 %v3828_v47 }
 0x23e   :  { %1214 = vmatprep.subr.mxu0 %v3701_v27  ;;  %3097 = vmatprep.subr.mxu1 %v4908_v13 }
 0x23f   :  { %1215 = vmatpush1.msra.mxu0 %v3708_v28  ;;  %3098 = vmatpush3.msra.mxu1 %v3839_v49 }
 0x240   :  { %1216 = vmatprep.subr.mxu0 %v3720_v30  ;;  %3099 = vmatprep.subr.mxu1 %v4908_v13 }
 0x241   :  { %1217 = vmatpush1.msra.mxu0 %v3727_v31  ;;  %3100 = vmatpush3.msra.mxu1 %v3848_v50 }
 0x242   :  { %1218 = vmatprep.subr.mxu0 %v3739_v33  ;;  %3101 = vmatprep.subr.mxu1 %v4908_v13 }
 0x243   :  { %1219 = vmatpush1.msra.mxu0 %v3746_v34  ;;  %3102 = vmatpush3.msra.mxu1 %v3857_v51 }
 0x244   :  { %1220 = vmatprep.subr.mxu0 %v3758_v36  ;;  %3103 = vmatprep.subr.mxu1 %v4908_v13 }
 0x245   :  { %1221 = vmatpush1.msra.mxu0 %v3765_v37  ;;  %3104 = vmatpush3.msra.mxu1 %v3866_v52  ;;  %v1086_v37 = vrot.slane %v884_v29, 1 }
 0x246   :  { %1222 = vmatprep.subr.mxu0 %v4915_v1  ;;  %3105 = vmatprep.subr.mxu1 %v4908_v13 }
 0x247   :  { %1223 = vmatpush1.msra.mxu0 %v4916_v2  ;;  %3106 = vmatpush3.msra.mxu1 %v4917_v4 }
 0x248   :  { %1224 = vmatprep.subr.mxu0 %v4918_v5  ;;  %3107 = vmatprep.subr.mxu1 %v4908_v13 }
 0x249   :  { %1225 = vmatpush1.msra.mxu0 %v4919_v7  ;;  %3108 = vmatpush3.msra.mxu1 %v4920_v9 }
 0x24a   :  { %1226 = vmatprep.subr.mxu0 %v4921_v11  ;;  %3109 = vmatprep.subr.mxu1 %v4908_v13 }
 0x24b   :  { %1227 = vmatpush1.msra.mxu0 %v4922_v12  ;;  %1260 = vmatprep.mubr.f32.mxu0 %v4908_v13 }
 0x24c   :  { %3110 = vmatpush3.msra.mxu1 %v4923_v14  ;;  %3111 = vmatprep.mubr.msk.f32.mxu1 %vm3503_vm2, %v4908_v13 }
 0x24d   :  { %1489 = vmatprep.subr.mxu0 %v4151_v15  ;;  %3114 = vmatprep.subr.mxu1 %v4908_v13 }
 0x2ec   :  { %v969_v17 = vpop.f32.mrf.mxu0  ;;  %v1040_v18 = vpop.f32.mrf.mxu1 }
 0x2ed   :  { %v1051_v19 = vrot.slane %v969_v17, %v3963_v6  ;;  %v1128_v3 = vadd.f32 %v4925_v59, %v1040_v18 }
 0x2ee   :  { %v971_v20 = vpop.f32.mrf.mxu0  ;;  %v3078_v22 = vpop.f32.mrf.mxu1 }
 0x2ef   :  { %v1052_v23 = vcombine.high %v1051_v19, %v1051_v19  ;;  %v1059_v24 = vrot.slane %v1051_v19, %v3963_v6  ;;  %v1096_v25 = vrot.slane %v971_v20, %v3963_v6  ;;  %v1136_v55 = vrot.slane %v1128_v3, %v3963_v6  ;;  %v4192_v19 = vld [vmem:[%s4846_s2 + $0x158] sm:$0xff]  ;;  %v4199_v20 = vld [vmem:[%s4846_s2 + $0x150] sm:$0xff]  ;;  %v4205_v22 = vld [vmem:[%s4846_s2 + $0x160] sm:$0xff] }
 0x2f0   :  { %v4357_v3 = vld [vmem:[%s4846_s2 + $0xa0] sm:$0xff] }
 0x2f1   :  { %v1066_v27 = vrot.slane %v1052_v23, %v3963_v6  ;;  %v1069_v28 = vadd.f32 %v1059_v24, %v882_v26  ;;  %v1097_v30 = vcombine.high %v1096_v25, %v1096_v25  ;;  %v1104_v33 = vrot.slane %v1096_v25, %v3963_v6  ;;  %v4211_v23 = vld [vmem:[%s4846_s2 + $0x140] sm:$0xff]  ;;  %v4218_v24 = vld [vmem:[%s4846_s2 + $0x138] sm:$0xff]  ;;  %v4224_v25 = vld [vmem:[%s4846_s2 + $0x148] sm:$0xff] }
 0x2f2   :  { %v1137_v39 = vcombine.high %v1136_v55, %v1136_v55  ;;  %v1144_v45 = vrot.slane %v1136_v55, %v3963_v6  ;;  %v4230_v26 = vld [vmem:[%s4846_s2 + $0x128] sm:$0xff]  ;;  %v4363_v55 = vld [vmem:[%s4846_s2 + $0x80] sm:$0xff] }
 0x2f3   :  { %v1070_v31 = vadd.f32 %v1066_v27, %v884_v29  ;;  %v2785_v32 = vmul.f32 -1.442695, %v1069_v28  ;;  %v1111_v36 = vrot.slane %v1097_v30, %v3963_v6  ;;  %v1114_v38 = vadd.f32 %v1104_v33, %v1085_v35  ;;  %v4237_v27 = vld [vmem:[%s4846_s2 + $0x120] sm:$0xff]  ;;  %v4243_v28 = vld [vmem:[%s4846_s2 + $0x130] sm:$0xff]  ;;  %v4256_v30 = vld [vmem:[%s4846_s2 + $0x108] sm:$0xff] }
 0x2f4   :  { %v1151_v10 = vrot.slane %v1137_v39, %v3963_v6  ;;  %v4249_v29 = vld [vmem:[%s4846_s2 + $0x110] sm:$0xff]  ;;  %v4287_v35 = vld [vmem:[%s4846_s2 + $0xe0] sm:$0xff]  ;;  %v4382_v39 = vld [vmem:[%s4846_s2 + $0x68] sm:$0xff] }
 0x2f5   :  { %3333 = vpow2.f32 %v2785_v32  ;;  %v2786_v34 = vmul.f32 -1.442695, %v1070_v31  ;;  %v1115_v41 = vadd.f32 %v1111_v36, %v1086_v37  ;;  %v2787_v44 = vmul.f32 -1.442695, %v1114_v38  ;;  %v4262_v31 = vld [vmem:[%s4846_s2 + $0x118] sm:$0xff]  ;;  %v4275_v33 = vld [vmem:[%s4846_s2 + $0xf0] sm:$0xff] }
 0x2f6   :  { %v4268_v32 = vld [vmem:[%s4846_s2 + $0xf8] sm:$0xff]  ;;  %v4300_v37 = vld [vmem:[%s4846_s2 + $0xe8] sm:$0xff] }
 0x2f7   :  { %3335 = vpow2.f32 %v2786_v34  ;;  %v2788_v47 = vmul.f32 -1.442695, %v1115_v41  ;;  %v4281_v34 = vld [vmem:[%s4846_s2 + $0x100] sm:$0xff]  ;;  %v4294_v36 = vld [vmem:[%s4846_s2 + $0xd8] sm:$0xff]  ;;  %v4306_v38 = vld [vmem:[%s4846_s2 + $0xc8] sm:$0xff] }
 0x2f8   :  { %3337 = vpow2.f32 %v2787_v44  ;;  %v4313_v41 = vld [vmem:[%s4846_s2 + $0xc0] sm:$0xff]  ;;  %v4319_v44 = vld [vmem:[%s4846_s2 + $0xd0] sm:$0xff] }
 0x2f9   :  { %3339 = vpow2.f32 %v2788_v47  ;;  %v4325_v47 = vld [vmem:[%s4846_s2 + $0xb0] sm:$0xff] }
 0x302   :  { %v3334_v49 = vpop.eup %3333 }
 0x303   :  { %v1077_v50 = vadd.f32 1.0, %v3334_v49  ;;  %v4332_v49 = vld [vmem:[%s4846_s2 + $0xa8] sm:$0xff] }
 0x304   :  { %v3336_v51 = vpop.eup %3335 }
 0x305   :  { %v1078_v52 = vadd.f32 1.0, %v3336_v51  ;;  %3341 = vrcp.f32 %v1077_v50  ;;  %v3338_v40 = vpop.eup %3337  ;;  %v4338_v50 = vld [vmem:[%s4846_s2 + $0xb8] sm:$0xff] }
 0x306   :  { %v3340_v60 = vpop.eup %3339  ;;  %v1122_v8 = vadd.f32 1.0, %v3338_v40  ;;  %v4344_v51 = vld [vmem:[%s4846_s2 + $0x98] sm:$0xff] }
 0x307   :  { %3343 = vrcp.f32 %v1078_v52  ;;  %v1123_v63 = vadd.f32 1.0, %v3340_v60  ;;  %v4351_v52 = vld [vmem:[%s4846_s2 + $0x90] sm:$0xff]  ;;  %v4370_v40 = vld [vmem:[%s4846_s2 + $0x78] sm:$0xff]  ;;  %v4376_v60 = vld [vmem:[%s4846_s2 + $0x88] sm:$0xff] }
 0x308   :  { %3345 = vrcp.f32 %v1122_v8  ;;  %v4389_v8 = vld [vmem:[%s4846_s2 + $0x60] sm:$0xff] }
 0x309   :  { %3347 = vrcp.f32 %v1123_v63  ;;  %v4401_v63 = vld [vmem:[%s4846_s2 + $0x50] sm:$0xff] }
 0x312   :  { %v3342_v58 = vpop.eup %3341 }
 0x313   :  { %v1154_v21 = vmul.f32 %v3342_v58, %v1144_v45  ;;  %v4395_v45 = vld [vmem:[%s4846_s2 + $0x70] sm:$0xff]  ;;  %v4408_v58 = vld [vmem:[%s4846_s2 + $0x48] sm:$0xff] }
 0x314   :  { %v3344_v46 = vpop.eup %3343 }
 0x315   :  { %v1155_v57 = vmul.f32 %v3344_v46, %v1151_v10  ;;  %v1160_v48 = vadd.f32 %v1156_v61, %v1154_v21  ;;  %v3346_v62 = vpop.eup %3345  ;;  %v4414_v61 = vld [vmem:[%s4846_s2 + $0x58] sm:$0xff]  ;;  %v4427_v21 = vld [vmem:[%s4846_s2 + $0x30] sm:$0xff]  ;;  %v4433_v46 = vld [vmem:[%s4846_s2 + $0x40] sm:$0xff] }
 0x316   :  { %v3348_v54 = vpop.eup %3347  ;;  %v1164_v53 = vsub.f32 1.0, %v3346_v62  ;;  %v1168_v4 = vmul.f32 %v3346_v62, %v4073_v42  ;;  %v4180_v42 = vld [vmem:[%s4846_s2 + $0x168] sm:$0xff]  ;;  %v4420_v10 = vld [vmem:[%s4846_s2 + $0x38] sm:$0xff]  ;;  %4927 = vst [vmem:[#allocation7_spill] sm:$0xff] %v4427_v21  ;;  %4928 = vst [vmem:[#allocation12_spill] sm:$0xff] %v4433_v46 }
 0x317   :  { %v1161_v0 = vadd.f32 %v1157_v16, %v1155_v57  ;;  %3349 = vtanh.f32 %v1160_v48  ;;  %v1165_v1 = vsub.f32 1.0, %v3348_v54  ;;  %v1169_v9 = vmul.f32 %v3348_v54, %v4075_v43  ;;  %v4186_v43 = vld [vmem:[%s4846_s2 + $0x178] sm:$0xff]  ;;  %4926 = vst [vmem:[#allocation6_spill] sm:$0xff] %v4420_v10  ;;  %v4439_v16 = vld [vmem:[%s4846_s2 + $0x20] sm:$0xff]  ;;  %v4452_v48 = vld [vmem:[%s4846_s2 + $0x28] sm:$0xff] }
 0x318   :  { %4929 = vst [vmem:[#allocation8_spill] sm:$0xff] %v4439_v16  ;;  %v4446_v57 = vld [vmem:[%s4846_s2 + $0x18] sm:$0xff]  ;;  %4931 = vst [vmem:[#allocation13_spill] sm:$0xff] %v4452_v48  ;;  %v4465_v62 = vld [vmem:[%s4846_s2] sm:$0xff] }
 0x319   :  { %3351 = vtanh.f32 %v1161_v0  ;;  %4930 = vst [vmem:[#allocation9_spill] sm:$0xff] %v4446_v57  ;;  %v4458_v0 = vld [vmem:[%s4846_s2 + $0x8] sm:$0xff]  ;;  %4933 = vst [vmem:[#allocation11_spill] sm:$0xff] %v4465_v62  ;;  %v4472_v54 = vld [vmem:[%s4846_s2 + $0x10] sm:$0xff] }
 0x31a   :  { %4932 = vst [vmem:[#allocation10_spill] sm:$0xff] %v4458_v0  ;;  %4934 = vst [vmem:[#allocation14_spill] sm:$0xff] %v4472_v54 }
 0x324   :  { %v3350_v56 = vpop.eup %3349 }
 0x325   :  { %v1166_v2 = vmul.f32 %v3350_v56, %v1164_v53 }
 0x326   :  { %v3352_v5 = vpop.eup %3351 }
 0x327   :  { %v1167_v7 = vmul.f32 %v3352_v5, %v1165_v1  ;;  %v4167_v11 = vadd.f32 %v1168_v4, %v1166_v2 }
 0x329   :  { %v4169_v12 = vadd.f32 %v1169_v9, %v1167_v7  ;;  %1172 = vst [vmem:[#allocation3 + $0x2] sm:$0x1] %v4167_v11 }
 0x32b   :  { %1173 = vst [vmem:[#allocation3 + $0xa] sm:$0x1] %v4169_v12  ;;  %v1180_v14 = vcombine.low %v4167_v11, %v4169_v12 }
 0x32d   :  { %v1187_v17 = vrot.slane %v1180_v14, %v3963_v6  ;;  %v1175_v14 = vld [vmem:[#allocation2 + $0x3] ss:$8 sm:$0x7] }
 0x32f   :  { %v1194_v18 = vrot.slane %v1187_v17, %v3963_v6 }
 0x331   :  { %1261 = vmatmul.mubr.f32.vlgmr.msra.gmra.mxu0 %v1194_v18  ;;  %3112 = vmatmul.mubr.f32.vlgmr.msra.gmra.mxu1 %v1194_v18 }
 0x332   :  { %1490 = vmatpush1.msra.mxu0 %v4180_v42  ;;  %3115 = vmatpush3.msra.mxu1 %v4186_v43 }
 0x333   :  { %1491 = vmatprep.subr.mxu0 %v4192_v19  ;;  %3116 = vmatprep.subr.mxu1 %v4908_v13 }
 0x334   :  { %1492 = vmatpush1.msra.mxu0 %v4199_v20  ;;  %3117 = vmatpush3.msra.mxu1 %v4205_v22 }
 0x335   :  { %1493 = vmatprep.subr.mxu0 %v4211_v23  ;;  %3118 = vmatprep.subr.mxu1 %v4908_v13 }
 0x336   :  { %1494 = vmatpush1.msra.mxu0 %v4218_v24  ;;  %3119 = vmatpush3.msra.mxu1 %v4224_v25 }
 0x337   :  { %1495 = vmatprep.subr.mxu0 %v4230_v26  ;;  %3120 = vmatprep.subr.mxu1 %v4908_v13 }
 0x338   :  { %1496 = vmatpush1.msra.mxu0 %v4237_v27  ;;  %3121 = vmatpush3.msra.mxu1 %v4243_v28 }
 0x339   :  { %1497 = vmatprep.subr.mxu0 %v4249_v29  ;;  %3122 = vmatprep.subr.mxu1 %v4908_v13 }
 0x33a   :  { %1498 = vmatpush1.msra.mxu0 %v4256_v30  ;;  %3123 = vmatpush3.msra.mxu1 %v4262_v31 }
 0x33b   :  { %1499 = vmatprep.subr.mxu0 %v4268_v32  ;;  %3124 = vmatprep.subr.mxu1 %v4908_v13 }
 0x33c   :  { %1500 = vmatpush1.msra.mxu0 %v4275_v33  ;;  %3125 = vmatpush3.msra.mxu1 %v4281_v34 }
 0x33d   :  { %1501 = vmatprep.subr.mxu0 %v4287_v35  ;;  %3126 = vmatprep.subr.mxu1 %v4908_v13 }
 0x33e   :  { %1502 = vmatpush1.msra.mxu0 %v4294_v36  ;;  %3127 = vmatpush3.msra.mxu1 %v4300_v37 }
 0x33f   :  { %1503 = vmatprep.subr.mxu0 %v4306_v38  ;;  %3128 = vmatprep.subr.mxu1 %v4908_v13 }
 0x340   :  { %1504 = vmatpush1.msra.mxu0 %v4313_v41  ;;  %3129 = vmatpush3.msra.mxu1 %v4319_v44 }
 0x341   :  { %1505 = vmatprep.subr.mxu0 %v4325_v47  ;;  %3130 = vmatprep.subr.mxu1 %v4908_v13 }
 0x342   :  { %1506 = vmatpush1.msra.mxu0 %v4332_v49  ;;  %3131 = vmatpush3.msra.mxu1 %v4338_v50 }
 0x343   :  { %1507 = vmatprep.subr.mxu0 %v4344_v51  ;;  %3132 = vmatprep.subr.mxu1 %v4908_v13 }
 0x344   :  { %1508 = vmatpush1.msra.mxu0 %v4351_v52  ;;  %3133 = vmatpush3.msra.mxu1 %v4357_v3 }
 0x345   :  { %1509 = vmatprep.subr.mxu0 %v4363_v55  ;;  %3134 = vmatprep.subr.mxu1 %v4908_v13 }
 0x346   :  { %1510 = vmatpush1.msra.mxu0 %v4370_v40  ;;  %3135 = vmatpush3.msra.mxu1 %v4376_v60 }
 0x347   :  { %1511 = vmatprep.subr.mxu0 %v4382_v39  ;;  %3136 = vmatprep.subr.mxu1 %v4908_v13 }
 0x348   :  { %1512 = vmatpush1.msra.mxu0 %v4389_v8  ;;  %3137 = vmatpush3.msra.mxu1 %v4395_v45 }
 0x349   :  { %1513 = vmatprep.subr.mxu0 %v4401_v63  ;;  %3138 = vmatprep.subr.mxu1 %v4908_v13 }
 0x34a   :  { %1514 = vmatpush1.msra.mxu0 %v4408_v58  ;;  %3139 = vmatpush3.msra.mxu1 %v4414_v61 }
 0x34b   :  { %1515 = vmatprep.subr.mxu0 %v4420_v10  ;;  %3140 = vmatprep.subr.mxu1 %v4908_v13 }
 0x34c   :  { %1516 = vmatpush1.msra.mxu0 %v4427_v21  ;;  %3141 = vmatpush3.msra.mxu1 %v4433_v46 }
 0x34d   :  { %1517 = vmatprep.subr.mxu0 %v4439_v16  ;;  %3142 = vmatprep.subr.mxu1 %v4908_v13 }
 0x34e   :  { %1518 = vmatpush1.msra.mxu0 %v4446_v57  ;;  %3143 = vmatpush3.msra.mxu1 %v4452_v48 }
 0x34f   :  { %1519 = vmatprep.subr.mxu0 %v4458_v0  ;;  %3144 = vmatprep.subr.mxu1 %v4908_v13 }
 0x350   :  { %1520 = vmatpush1.msra.mxu0 %v4465_v62  ;;  %1553 = vmatprep.mubr.f32.mxu0 %v4908_v13 }
 0x351   :  { %3145 = vmatpush3.msra.mxu1 %v4472_v54  ;;  %3146 = vmatprep.mubr.msk.f32.mxu1 %vm3503_vm2, %v4908_v13  ;;  %v1177_v54 = vld [vmem:[#allocation2 + $0x1b] ss:$8 sm:$0x7] }
 0x352   :  { %1782 = vmatprep.subr.mxu0 %v4151_v15  ;;  %3149 = vmatprep.subr.mxu1 %v4908_v13  ;;  %v1379_v16 = vrot.slane %v1177_v54, 1 }
 0x3f1   :  { %v1262_v53 = vpop.f32.mrf.mxu0  ;;  %v1333_v56 = vpop.f32.mrf.mxu1 }
 0x3f2   :  { %v1344_v1 = vrot.slane %v1262_v53, %v3963_v6  ;;  %v1378_v53 = vrot.slane %v1175_v14, 1 }
 0x3f3   :  { %v1264_v2 = vpop.f32.mrf.mxu0  ;;  %v3113_v4 = vpop.f32.mrf.mxu1 }
 0x3f4   :  { %v1345_v5 = vcombine.high %v1344_v1, %v1344_v1  ;;  %v1352_v7 = vrot.slane %v1344_v1, %v3963_v6  ;;  %v1389_v9 = vrot.slane %v1264_v2, %v3963_v6 }
 0x3f6   :  { %v1359_v17 = vrot.slane %v1345_v5, %v3963_v6  ;;  %v1362_v18 = vadd.f32 %v1352_v7, %v1175_v14  ;;  %v1390_v62 = vcombine.high %v1389_v9, %v1389_v9  ;;  %v1397_v48 = vrot.slane %v1389_v9, %v3963_v6 }
 0x3f8   :  { %v1363_v15 = vadd.f32 %v1359_v17, %v1177_v54  ;;  %v2789_v0 = vmul.f32 -1.442695, %v1362_v18  ;;  %v1404_v4 = vrot.slane %v1390_v62, %v3963_v6  ;;  %v1407_v1 = vadd.f32 %v1397_v48, %v1378_v53 }
 0x3f9   :  { %v1449_v53 = vrot.slane %v1175_v14, 2 }
 0x3fa   :  { %3353 = vpow2.f32 %v2789_v0  ;;  %v2790_v57 = vmul.f32 -1.442695, %v1363_v15  ;;  %v1408_v46 = vadd.f32 %v1404_v4, %v1379_v16  ;;  %v2791_v2 = vmul.f32 -1.442695, %v1407_v1 }
 0x3fb   :  { %v1421_v0 = vadd.f32 %v4925_v59, %v1333_v56  ;;  %v1450_v1 = vrot.slane %v1177_v54, 2 }
 0x3fc   :  { %3355 = vpow2.f32 %v2790_v57  ;;  %v2792_v21 = vmul.f32 -1.442695, %v1408_v46 }
 0x3fd   :  { %3357 = vpow2.f32 %v2791_v2  ;;  %v1429_v15 = vrot.slane %v1421_v0, %v3963_v6 }
 0x3fe   :  { %3359 = vpow2.f32 %v2792_v21 }
 0x3ff   :  { %v1430_v57 = vcombine.high %v1429_v15, %v1429_v15  ;;  %v1437_v16 = vrot.slane %v1429_v15, %v3963_v6 }
 0x401   :  { %v1444_v21 = vrot.slane %v1430_v57, %v3963_v6 }
 0x407   :  { %v3354_v5 = vpop.eup %3353 }
 0x408   :  { %v1370_v7 = vadd.f32 1.0, %v3354_v5 }
 0x409   :  { %v3356_v10 = vpop.eup %3355 }
 0x40a   :  { %v1371_v17 = vadd.f32 1.0, %v3356_v10  ;;  %3361 = vrcp.f32 %v1370_v7  ;;  %v3358_v9 = vpop.eup %3357 }
 0x40b   :  { %v3360_v62 = vpop.eup %3359  ;;  %v1415_v18 = vadd.f32 1.0, %v3358_v9 }
 0x40c   :  { %3363 = vrcp.f32 %v1371_v17  ;;  %v1416_v48 = vadd.f32 1.0, %v3360_v62 }
 0x40d   :  { %3365 = vrcp.f32 %v1415_v18 }
 0x40e   :  { %3367 = vrcp.f32 %v1416_v48 }
 0x417   :  { %v3362_v46 = vpop.eup %3361 }
 0x418   :  { %v1447_v4 = vmul.f32 %v3362_v46, %v1437_v16 }
 0x419   :  { %v3364_v10 = vpop.eup %3363 }
 0x41a   :  { %v1448_v2 = vmul.f32 %v3364_v10, %v1444_v21  ;;  %v1453_v5 = vadd.f32 %v1449_v53, %v1447_v4  ;;  %v3366_v56 = vpop.eup %3365  ;;  %v4937_v21 = vld [vmem:[#allocation12_spill] sm:$0xff]  ;;  %v4939_v10 = vld [vmem:[#allocation9_spill] sm:$0xff] }
 0x41b   :  { %v3368_v7 = vpop.eup %3367  ;;  %v1457_v17 = vsub.f32 1.0, %v3366_v56  ;;  %v1461_v14 = vmul.f32 %v3366_v56, %v4167_v11  ;;  %v4935_v11 = vld [vmem:[#allocation6_spill] sm:$0xff]  ;;  %v4938_v4 = vld [vmem:[#allocation8_spill] sm:$0xff]  ;;  %v4944_v56 = vld [vmem:[#allocation5_spill] sm:$0xff] }
 0x41c   :  { %v1454_v59 = vadd.f32 %v1450_v1, %v1448_v2  ;;  %3369 = vtanh.f32 %v1453_v5  ;;  %v1458_v15 = vsub.f32 1.0, %v3368_v7  ;;  %v1462_v18 = vmul.f32 %v3368_v7, %v4169_v12  ;;  %v4936_v12 = vld [vmem:[#allocation7_spill] sm:$0xff]  ;;  %v4940_v1 = vld [vmem:[#allocation13_spill] sm:$0xff]  ;;  %v4941_v2 = vld [vmem:[#allocation10_spill] sm:$0xff] }
 0x41d   :  { %v4942_v5 = vld [vmem:[#allocation11_spill] sm:$0xff] }
 0x41e   :  { %3371 = vtanh.f32 %v1454_v59  ;;  %v4943_v59 = vld [vmem:[#allocation14_spill] sm:$0xff] }
 0x429   :  { %v3370_v0 = vpop.eup %3369 }
 0x42a   :  { %v1459_v9 = vmul.f32 %v3370_v0, %v1457_v17 }
 0x42b   :  { %v3372_v62 = vpop.eup %3371 }
 0x42c   :  { %v1460_v57 = vmul.f32 %v3372_v62, %v1458_v15  ;;  %v4491_v16 = vadd.f32 %v1461_v14, %v1459_v9 }
 0x42e   :  { %v4493_v54 = vadd.f32 %v1462_v18, %v1460_v57  ;;  %1465 = vst [vmem:[#allocation3 + $0x3] sm:$0x1] %v4491_v16  ;;  %v1468_v18 = vld [vmem:[#allocation2 + $0x4] ss:$8 sm:$0x7] }
 0x430   :  { %1466 = vst [vmem:[#allocation3 + $0xb] sm:$0x1] %v4493_v54  ;;  %v1473_v48 = vcombine.low %v4491_v16, %v4493_v54 }
 0x432   :  { %v1480_v46 = vrot.slane %v1473_v48, %v3963_v6 }
 0x434   :  { %v1487_v53 = vrot.slane %v1480_v46, %v3963_v6 }
 0x436   :  { %1554 = vmatmul.mubr.f32.vlgmr.msra.gmra.mxu0 %v1487_v53  ;;  %3147 = vmatmul.mubr.f32.vlgmr.msra.gmra.mxu1 %v1487_v53  ;;  %v1470_v53 = vld [vmem:[#allocation2 + $0x1c] ss:$8 sm:$0x7] }
 0x437   :  { %1783 = vmatpush1.msra.mxu0 %v4180_v42  ;;  %3150 = vmatpush3.msra.mxu1 %v4186_v43 }
 0x438   :  { %1784 = vmatprep.subr.mxu0 %v4192_v19  ;;  %3151 = vmatprep.subr.mxu1 %v4908_v13 }
 0x439   :  { %1785 = vmatpush1.msra.mxu0 %v4199_v20  ;;  %3152 = vmatpush3.msra.mxu1 %v4205_v22 }
 0x43a   :  { %1786 = vmatprep.subr.mxu0 %v4211_v23  ;;  %3153 = vmatprep.subr.mxu1 %v4908_v13 }
 0x43b   :  { %1787 = vmatpush1.msra.mxu0 %v4218_v24  ;;  %3154 = vmatpush3.msra.mxu1 %v4224_v25 }
 0x43c   :  { %1788 = vmatprep.subr.mxu0 %v4230_v26  ;;  %3155 = vmatprep.subr.mxu1 %v4908_v13 }
 0x43d   :  { %1789 = vmatpush1.msra.mxu0 %v4237_v27  ;;  %3156 = vmatpush3.msra.mxu1 %v4243_v28 }
 0x43e   :  { %1790 = vmatprep.subr.mxu0 %v4249_v29  ;;  %3157 = vmatprep.subr.mxu1 %v4908_v13 }
 0x43f   :  { %1791 = vmatpush1.msra.mxu0 %v4256_v30  ;;  %3158 = vmatpush3.msra.mxu1 %v4262_v31 }
 0x440   :  { %1792 = vmatprep.subr.mxu0 %v4268_v32  ;;  %3159 = vmatprep.subr.mxu1 %v4908_v13 }
 0x441   :  { %1793 = vmatpush1.msra.mxu0 %v4275_v33  ;;  %3160 = vmatpush3.msra.mxu1 %v4281_v34 }
 0x442   :  { %1794 = vmatprep.subr.mxu0 %v4287_v35  ;;  %3161 = vmatprep.subr.mxu1 %v4908_v13 }
 0x443   :  { %1795 = vmatpush1.msra.mxu0 %v4294_v36  ;;  %3162 = vmatpush3.msra.mxu1 %v4300_v37 }
 0x444   :  { %1796 = vmatprep.subr.mxu0 %v4306_v38  ;;  %3163 = vmatprep.subr.mxu1 %v4908_v13 }
 0x445   :  { %1797 = vmatpush1.msra.mxu0 %v4313_v41  ;;  %3164 = vmatpush3.msra.mxu1 %v4319_v44 }
 0x446   :  { %1798 = vmatprep.subr.mxu0 %v4325_v47  ;;  %3165 = vmatprep.subr.mxu1 %v4908_v13 }
 0x447   :  { %1799 = vmatpush1.msra.mxu0 %v4332_v49  ;;  %3166 = vmatpush3.msra.mxu1 %v4338_v50 }
 0x448   :  { %1800 = vmatprep.subr.mxu0 %v4344_v51  ;;  %3167 = vmatprep.subr.mxu1 %v4908_v13 }
 0x449   :  { %1801 = vmatpush1.msra.mxu0 %v4351_v52  ;;  %3168 = vmatpush3.msra.mxu1 %v4357_v3 }
 0x44a   :  { %1802 = vmatprep.subr.mxu0 %v4363_v55  ;;  %3169 = vmatprep.subr.mxu1 %v4908_v13 }
 0x44b   :  { %1803 = vmatpush1.msra.mxu0 %v4370_v40  ;;  %3170 = vmatpush3.msra.mxu1 %v4376_v60 }
 0x44c   :  { %1804 = vmatprep.subr.mxu0 %v4382_v39  ;;  %3171 = vmatprep.subr.mxu1 %v4908_v13 }
 0x44d   :  { %1805 = vmatpush1.msra.mxu0 %v4389_v8  ;;  %3172 = vmatpush3.msra.mxu1 %v4395_v45 }
 0x44e   :  { %1806 = vmatprep.subr.mxu0 %v4401_v63  ;;  %3173 = vmatprep.subr.mxu1 %v4908_v13 }
 0x44f   :  { %1807 = vmatpush1.msra.mxu0 %v4408_v58  ;;  %3174 = vmatpush3.msra.mxu1 %v4414_v61 }
 0x450   :  { %1808 = vmatprep.subr.mxu0 %v4935_v11  ;;  %3175 = vmatprep.subr.mxu1 %v4908_v13 }
 0x451   :  { %1809 = vmatpush1.msra.mxu0 %v4936_v12  ;;  %3176 = vmatpush3.msra.mxu1 %v4937_v21 }
 0x452   :  { %1810 = vmatprep.subr.mxu0 %v4938_v4  ;;  %3177 = vmatprep.subr.mxu1 %v4908_v13 }
 0x453   :  { %1811 = vmatpush1.msra.mxu0 %v4939_v10  ;;  %3178 = vmatpush3.msra.mxu1 %v4940_v1  ;;  %v1672_v10 = vrot.slane %v1470_v53, 1 }
 0x454   :  { %1812 = vmatprep.subr.mxu0 %v4941_v2  ;;  %3179 = vmatprep.subr.mxu1 %v4908_v13 }
 0x455   :  { %1813 = vmatpush1.msra.mxu0 %v4942_v5  ;;  %1846 = vmatprep.mubr.f32.mxu0 %v4908_v13 }
 0x456   :  { %3180 = vmatpush3.msra.mxu1 %v4943_v59  ;;  %3181 = vmatprep.mubr.msk.f32.mxu1 %vm3503_vm2, %v4908_v13 }
 0x457   :  { %2075 = vmatprep.subr.mxu0 %v4944_v56  ;;  %3184 = vmatprep.subr.mxu1 %v4908_v13 }
 0x4f6   :  { %v1555_v7 = vpop.f32.mrf.mxu0  ;;  %v1626_v17 = vpop.f32.mrf.mxu1 }
 0x4f7   :  { %v1637_v0 = vrot.slane %v1555_v7, %v3963_v6  ;;  %v1671_v7 = vrot.slane %v1468_v18, 1 }
 0x4f8   :  { %v1557_v15 = vpop.f32.mrf.mxu0  ;;  %v3148_v9 = vpop.f32.mrf.mxu1 }
 0x4f9   :  { %v1638_v14 = vcombine.high %v1637_v0, %v1637_v0  ;;  %v1645_v62 = vrot.slane %v1637_v0, %v3963_v6  ;;  %v1682_v57 = vrot.slane %v1557_v15, %v3963_v6 }
 0x4fb   :  { %v1652_v48 = vrot.slane %v1638_v14, %v3963_v6  ;;  %v1655_v46 = vadd.f32 %v1645_v62, %v1468_v18  ;;  %v1683_v59 = vcombine.high %v1682_v57, %v1682_v57  ;;  %v1690_v2 = vrot.slane %v1682_v57, %v3963_v6 }
 0x4fd   :  { %v1656_v56 = vadd.f32 %v1652_v48, %v1470_v53  ;;  %v2793_v5 = vmul.f32 -1.442695, %v1655_v46  ;;  %v1697_v9 = vrot.slane %v1683_v59, %v3963_v6  ;;  %v1700_v0 = vadd.f32 %v1690_v2, %v1671_v7 }
 0x4ff   :  { %3373 = vpow2.f32 %v2793_v5  ;;  %v2794_v1 = vmul.f32 -1.442695, %v1656_v56  ;;  %v1701_v4 = vadd.f32 %v1697_v9, %v1672_v10  ;;  %v2795_v15 = vmul.f32 -1.442695, %v1700_v0  ;;  %v4577_v5 = vld [vmem:[%s4851_s4] ss:$0 sm:$0xff] }
 0x500   :  { %4945 = vst [vmem:[#allocation15_spill] sm:$0xff] %v4577_v5 }
 0x501   :  { %3375 = vpow2.f32 %v2794_v1  ;;  %v2796_v21 = vmul.f32 -1.442695, %v1701_v4  ;;  %v1714_v1 = vadd.f32 %v4577_v5, %v1626_v17 }
 0x502   :  { %3377 = vpow2.f32 %v2795_v15  ;;  %v1743_v15 = vrot.slane %v1470_v53, 2 }
 0x503   :  { %3379 = vpow2.f32 %v2796_v21  ;;  %v1722_v2 = vrot.slane %v1714_v1, %v3963_v6 }
 0x505   :  { %v1723_v4 = vcombine.high %v1722_v2, %v1722_v2  ;;  %v1730_v21 = vrot.slane %v1722_v2, %v3963_v6 }
 0x507   :  { %v1737_v7 = vrot.slane %v1723_v4, %v3963_v6 }
 0x50c   :  { %v3374_v14 = vpop.eup %3373 }
 0x50d   :  { %v1663_v62 = vadd.f32 1.0, %v3374_v14 }
 0x50e   :  { %v3376_v12 = vpop.eup %3375 }
 0x50f   :  { %v1664_v48 = vadd.f32 1.0, %v3376_v12  ;;  %3381 = vrcp.f32 %v1663_v62  ;;  %v3378_v10 = vpop.eup %3377  ;;  %v1742_v12 = vrot.slane %v1468_v18, 2 }
 0x510   :  { %v3380_v59 = vpop.eup %3379  ;;  %v1708_v56 = vadd.f32 1.0, %v3378_v10 }
 0x511   :  { %3383 = vrcp.f32 %v1664_v48  ;;  %v1709_v57 = vadd.f32 1.0, %v3380_v59 }
 0x512   :  { %3385 = vrcp.f32 %v1708_v56 }
 0x513   :  { %3387 = vrcp.f32 %v1709_v57 }
 0x51c   :  { %v3382_v46 = vpop.eup %3381 }
 0x51d   :  { %v1740_v9 = vmul.f32 %v3382_v46, %v1730_v21 }
 0x51e   :  { %v3384_v0 = vpop.eup %3383 }
 0x51f   :  { %v1741_v14 = vmul.f32 %v3384_v0, %v1737_v7  ;;  %v1746_v62 = vadd.f32 %v1742_v12, %v1740_v9  ;;  %v3386_v48 = vpop.eup %3385  ;;  %v4949_v12 = vld [vmem:[#allocation8_spill] sm:$0xff]  ;;  %v4950_v7 = vld [vmem:[#allocation9_spill] sm:$0xff]  ;;  %v4952_v0 = vld [vmem:[#allocation10_spill] sm:$0xff] }
 0x520   :  { %v3388_v1 = vpop.eup %3387  ;;  %v1750_v10 = vsub.f32 1.0, %v3386_v48  ;;  %v1754_v18 = vmul.f32 %v3386_v48, %v4491_v16  ;;  %v4946_v16 = vld [vmem:[#allocation6_spill] sm:$0xff]  ;;  %v4951_v9 = vld [vmem:[#allocation13_spill] sm:$0xff] }
 0x521   :  { %v1747_v17 = vadd.f32 %v1743_v15, %v1741_v14  ;;  %3389 = vtanh.f32 %v1746_v62  ;;  %v1751_v2 = vsub.f32 1.0, %v3388_v1  ;;  %v1755_v56 = vmul.f32 %v3388_v1, %v4493_v54  ;;  %v4947_v54 = vld [vmem:[#allocation7_spill] sm:$0xff]  ;;  %v4954_v14 = vld [vmem:[#allocation14_spill] sm:$0xff]  ;;  %v4955_v62 = vld [vmem:[#allocation5_spill] sm:$0xff] }
 0x522   :  { %v4953_v15 = vld [vmem:[#allocation11_spill] sm:$0xff] }
 0x523   :  { %3391 = vtanh.f32 %v1747_v17 }
 0x52e   :  { %v3390_v5 = vpop.eup %3389 }
 0x52f   :  { %v1752_v59 = vmul.f32 %v3390_v5, %v1750_v10 }
 0x530   :  { %v3392_v11 = vpop.eup %3391 }
 0x531   :  { %v1753_v4 = vmul.f32 %v3392_v11, %v1751_v2  ;;  %v4585_v21 = vadd.f32 %v1754_v18, %v1752_v59  ;;  %v4948_v11 = vld [vmem:[#allocation12_spill] sm:$0xff] }
 0x533   :  { %v4587_v53 = vadd.f32 %v1755_v56, %v1753_v4  ;;  %1758 = vst [vmem:[#allocation3 + $0x4] sm:$0x1] %v4585_v21  ;;  %v1761_v56 = vld [vmem:[#allocation2 + $0x5] ss:$8 sm:$0x7] }
 0x535   :  { %1759 = vst [vmem:[#allocation3 + $0xc] sm:$0x1] %v4587_v53  ;;  %v1766_v57 = vcombine.low %v4585_v21, %v4587_v53 }
 0x537   :  { %v1773_v46 = vrot.slane %v1766_v57, %v3963_v6 }
 0x539   :  { %v1780_v5 = vrot.slane %v1773_v46, %v3963_v6 }
 0x53b   :  { %1847 = vmatmul.mubr.f32.vlgmr.msra.gmra.mxu0 %v1780_v5  ;;  %3182 = vmatmul.mubr.f32.vlgmr.msra.gmra.mxu1 %v1780_v5  ;;  %v1763_v5 = vld [vmem:[#allocation2 + $0x1d] ss:$8 sm:$0x7] }
 0x53c   :  { %2076 = vmatpush1.msra.mxu0 %v4180_v42  ;;  %3185 = vmatpush3.msra.mxu1 %v4186_v43 }
 0x53d   :  { %2077 = vmatprep.subr.mxu0 %v4192_v19  ;;  %3186 = vmatprep.subr.mxu1 %v4908_v13 }
 0x53e   :  { %2078 = vmatpush1.msra.mxu0 %v4199_v20  ;;  %3187 = vmatpush3.msra.mxu1 %v4205_v22 }
 0x53f   :  { %2079 = vmatprep.subr.mxu0 %v4211_v23  ;;  %3188 = vmatprep.subr.mxu1 %v4908_v13 }
 0x540   :  { %2080 = vmatpush1.msra.mxu0 %v4218_v24  ;;  %3189 = vmatpush3.msra.mxu1 %v4224_v25 }
 0x541   :  { %2081 = vmatprep.subr.mxu0 %v4230_v26  ;;  %3190 = vmatprep.subr.mxu1 %v4908_v13 }
 0x542   :  { %2082 = vmatpush1.msra.mxu0 %v4237_v27  ;;  %3191 = vmatpush3.msra.mxu1 %v4243_v28 }
 0x543   :  { %2083 = vmatprep.subr.mxu0 %v4249_v29  ;;  %3192 = vmatprep.subr.mxu1 %v4908_v13 }
 0x544   :  { %2084 = vmatpush1.msra.mxu0 %v4256_v30  ;;  %3193 = vmatpush3.msra.mxu1 %v4262_v31 }
 0x545   :  { %2085 = vmatprep.subr.mxu0 %v4268_v32  ;;  %3194 = vmatprep.subr.mxu1 %v4908_v13 }
 0x546   :  { %2086 = vmatpush1.msra.mxu0 %v4275_v33  ;;  %3195 = vmatpush3.msra.mxu1 %v4281_v34 }
 0x547   :  { %2087 = vmatprep.subr.mxu0 %v4287_v35  ;;  %3196 = vmatprep.subr.mxu1 %v4908_v13 }
 0x548   :  { %2088 = vmatpush1.msra.mxu0 %v4294_v36  ;;  %3197 = vmatpush3.msra.mxu1 %v4300_v37 }
 0x549   :  { %2089 = vmatprep.subr.mxu0 %v4306_v38  ;;  %3198 = vmatprep.subr.mxu1 %v4908_v13 }
 0x54a   :  { %2090 = vmatpush1.msra.mxu0 %v4313_v41  ;;  %3199 = vmatpush3.msra.mxu1 %v4319_v44 }
 0x54b   :  { %2091 = vmatprep.subr.mxu0 %v4325_v47  ;;  %3200 = vmatprep.subr.mxu1 %v4908_v13 }
 0x54c   :  { %2092 = vmatpush1.msra.mxu0 %v4332_v49  ;;  %3201 = vmatpush3.msra.mxu1 %v4338_v50 }
 0x54d   :  { %2093 = vmatprep.subr.mxu0 %v4344_v51  ;;  %3202 = vmatprep.subr.mxu1 %v4908_v13 }
 0x54e   :  { %2094 = vmatpush1.msra.mxu0 %v4351_v52  ;;  %3203 = vmatpush3.msra.mxu1 %v4357_v3 }
 0x54f   :  { %2095 = vmatprep.subr.mxu0 %v4363_v55  ;;  %3204 = vmatprep.subr.mxu1 %v4908_v13 }
 0x550   :  { %2096 = vmatpush1.msra.mxu0 %v4370_v40  ;;  %3205 = vmatpush3.msra.mxu1 %v4376_v60 }
 0x551   :  { %2097 = vmatprep.subr.mxu0 %v4382_v39  ;;  %3206 = vmatprep.subr.mxu1 %v4908_v13 }
 0x552   :  { %2098 = vmatpush1.msra.mxu0 %v4389_v8  ;;  %3207 = vmatpush3.msra.mxu1 %v4395_v45 }
 0x553   :  { %2099 = vmatprep.subr.mxu0 %v4401_v63  ;;  %3208 = vmatprep.subr.mxu1 %v4908_v13 }
 0x554   :  { %2100 = vmatpush1.msra.mxu0 %v4408_v58  ;;  %3209 = vmatpush3.msra.mxu1 %v4414_v61 }
 0x555   :  { %2101 = vmatprep.subr.mxu0 %v4946_v16  ;;  %3210 = vmatprep.subr.mxu1 %v4908_v13 }
 0x556   :  { %2102 = vmatpush1.msra.mxu0 %v4947_v54  ;;  %3211 = vmatpush3.msra.mxu1 %v4948_v11 }
 0x557   :  { %2103 = vmatprep.subr.mxu0 %v4949_v12  ;;  %3212 = vmatprep.subr.mxu1 %v4908_v13 }
 0x558   :  { %2104 = vmatpush1.msra.mxu0 %v4950_v7  ;;  %3213 = vmatpush3.msra.mxu1 %v4951_v9  ;;  %v1965_v7 = vrot.slane %v1763_v5, 1 }
 0x559   :  { %2105 = vmatprep.subr.mxu0 %v4952_v0  ;;  %3214 = vmatprep.subr.mxu1 %v4908_v13 }
 0x55a   :  { %2106 = vmatpush1.msra.mxu0 %v4953_v15  ;;  %2139 = vmatprep.mubr.f32.mxu0 %v4908_v13 }
 0x55b   :  { %3215 = vmatpush3.msra.mxu1 %v4954_v14  ;;  %3216 = vmatprep.mubr.msk.f32.mxu1 %vm3503_vm2, %v4908_v13 }
 0x55c   :  { %2368 = vmatprep.subr.mxu0 %v4955_v62  ;;  %3219 = vmatprep.subr.mxu1 %v4908_v13 }
 0x5fb   :  { %v1848_v17 = vpop.f32.mrf.mxu0  ;;  %v1919_v48 = vpop.f32.mrf.mxu1 }
 0x5fc   :  { %v1930_v1 = vrot.slane %v1848_v17, %v3963_v6  ;;  %v1964_v17 = vrot.slane %v1761_v56, 1 }
 0x5fd   :  { %v1850_v10 = vpop.f32.mrf.mxu0  ;;  %v3183_v2 = vpop.f32.mrf.mxu1 }
 0x5fe   :  { %v1931_v59 = vcombine.high %v1930_v1, %v1930_v1  ;;  %v1938_v18 = vrot.slane %v1930_v1, %v3963_v6  ;;  %v1975_v4 = vrot.slane %v1850_v10, %v3963_v6 }
 0x600   :  { %v1945_v57 = vrot.slane %v1931_v59, %v3963_v6  ;;  %v1948_v46 = vadd.f32 %v1938_v18, %v1761_v56  ;;  %v1976_v14 = vcombine.high %v1975_v4, %v1975_v4  ;;  %v1983_v0 = vrot.slane %v1975_v4, %v3963_v6  ;;  %v4956_v4 = vld [vmem:[#allocation15_spill] sm:$0xff] }
 0x602   :  { %v1949_v62 = vadd.f32 %v1945_v57, %v1763_v5  ;;  %v2797_v15 = vmul.f32 -1.442695, %v1948_v46  ;;  %v1990_v2 = vrot.slane %v1976_v14, %v3963_v6  ;;  %v1993_v1 = vadd.f32 %v1983_v0, %v1964_v17 }
 0x603   :  { %v2035_v17 = vrot.slane %v1761_v56, 2 }
 0x604   :  { %3393 = vpow2.f32 %v2797_v15  ;;  %v2798_v9 = vmul.f32 -1.442695, %v1949_v62  ;;  %v1994_v12 = vadd.f32 %v1990_v2, %v1965_v7  ;;  %v2799_v10 = vmul.f32 -1.442695, %v1993_v1 }
 0x605   :  { %v2007_v15 = vadd.f32 %v4956_v4, %v1919_v48  ;;  %v2036_v1 = vrot.slane %v1763_v5, 2 }
 0x606   :  { %3395 = vpow2.f32 %v2798_v9  ;;  %v2800_v11 = vmul.f32 -1.442695, %v1994_v12 }
 0x607   :  { %3397 = vpow2.f32 %v2799_v10  ;;  %v2015_v46 = vrot.slane %v2007_v15, %v3963_v6 }
 0x608   :  { %3399 = vpow2.f32 %v2800_v11 }
 0x609   :  { %v2016_v9 = vcombine.high %v2015_v46, %v2015_v46  ;;  %v2023_v7 = vrot.slane %v2015_v46, %v3963_v6 }
 0x60b   :  { %v2030_v11 = vrot.slane %v2016_v9, %v3963_v6 }
 0x611   :  { %v3394_v59 = vpop.eup %3393 }
 0x612   :  { %v1956_v18 = vadd.f32 1.0, %v3394_v59 }
 0x613   :  { %v3396_v54 = vpop.eup %3395 }
 0x614   :  { %v1957_v57 = vadd.f32 1.0, %v3396_v54  ;;  %3401 = vrcp.f32 %v1956_v18  ;;  %v3398_v62 = vpop.eup %3397 }
 0x615   :  { %v3400_v14 = vpop.eup %3399  ;;  %v2001_v16 = vadd.f32 1.0, %v3398_v62 }
 0x616   :  { %3403 = vrcp.f32 %v1957_v57  ;;  %v2002_v0 = vadd.f32 1.0, %v3400_v14 }
 0x617   :  { %3405 = vrcp.f32 %v2001_v16 }
 0x618   :  { %3407 = vrcp.f32 %v2002_v0 }
 0x621   :  { %v3402_v12 = vpop.eup %3401 }
 0x622   :  { %v2033_v2 = vmul.f32 %v3402_v12, %v2023_v7 }
 0x623   :  { %v3404_v54 = vpop.eup %3403 }
 0x624   :  { %v2034_v10 = vmul.f32 %v3404_v54, %v2030_v11  ;;  %v2039_v59 = vadd.f32 %v2035_v17, %v2033_v2  ;;  %v3406_v18 = vpop.eup %3405 }
 0x625   :  { %v3408_v57 = vpop.eup %3407  ;;  %v2043_v15 = vsub.f32 1.0, %v3406_v18  ;;  %v2047_v56 = vmul.f32 %v3406_v18, %v4585_v21 }
 0x626   :  { %v2040_v48 = vadd.f32 %v2036_v1, %v2034_v10  ;;  %3409 = vtanh.f32 %v2039_v59  ;;  %v2044_v46 = vsub.f32 1.0, %v3408_v57  ;;  %v2048_v16 = vmul.f32 %v3408_v57, %v4587_v53 }
 0x628   :  { %3411 = vtanh.f32 %v2040_v48 }
 0x633   :  { %v3410_v62 = vpop.eup %3409 }
 0x634   :  { %v2045_v14 = vmul.f32 %v3410_v62, %v2043_v15 }
 0x635   :  { %v3412_v4 = vpop.eup %3411 }
 0x636   :  { %v2046_v9 = vmul.f32 %v3412_v4, %v2044_v46  ;;  %v4674_v7 = vadd.f32 %v2047_v56, %v2045_v14 }
 0x638   :  { %v4676_v5 = vadd.f32 %v2048_v16, %v2046_v9  ;;  %2051 = vst [vmem:[#allocation3 + $0x5] sm:$0x1] %v4674_v7 }
 0x63a   :  { %2052 = vst [vmem:[#allocation3 + $0xd] sm:$0x1] %v4676_v5  ;;  %v2059_v0 = vcombine.low %v4674_v7, %v4676_v5 }
 0x63c   :  { %v2066_v12 = vrot.slane %v2059_v0, %v3963_v6 }
 0x63e   :  { %v2073_v17 = vrot.slane %v2066_v12, %v3963_v6 }
 0x640   :  { %2140 = vmatmul.mubr.f32.vlgmr.msra.gmra.mxu0 %v2073_v17  ;;  %3217 = vmatmul.mubr.f32.vlgmr.msra.gmra.mxu1 %v2073_v17 }
 0x641   :  { %2369 = vmatpush1.msra.mxu0 %v4180_v42  ;;  %3220 = vmatpush3.msra.mxu1 %v4186_v43  ;;  %v4957_v42 = vld [vmem:[#allocation6_spill] sm:$0xff]  ;;  %v4958_v43 = vld [vmem:[#allocation7_spill] sm:$0xff] }
 0x642   :  { %2370 = vmatprep.subr.mxu0 %v4192_v19  ;;  %3221 = vmatprep.subr.mxu1 %v4908_v13  ;;  %v4959_v19 = vld [vmem:[#allocation12_spill] sm:$0xff] }
 0x643   :  { %2371 = vmatpush1.msra.mxu0 %v4199_v20  ;;  %3222 = vmatpush3.msra.mxu1 %v4205_v22  ;;  %v4960_v20 = vld [vmem:[#allocation8_spill] sm:$0xff]  ;;  %v4961_v22 = vld [vmem:[#allocation9_spill] sm:$0xff] }
 0x644   :  { %2372 = vmatprep.subr.mxu0 %v4211_v23  ;;  %3223 = vmatprep.subr.mxu1 %v4908_v13  ;;  %v4962_v23 = vld [vmem:[#allocation13_spill] sm:$0xff] }
 0x645   :  { %2373 = vmatpush1.msra.mxu0 %v4218_v24  ;;  %3224 = vmatpush3.msra.mxu1 %v4224_v25  ;;  %v4963_v24 = vld [vmem:[#allocation10_spill] sm:$0xff]  ;;  %v4964_v25 = vld [vmem:[#allocation11_spill] sm:$0xff] }
 0x646   :  { %2374 = vmatprep.subr.mxu0 %v4230_v26  ;;  %3225 = vmatprep.subr.mxu1 %v4908_v13  ;;  %v4965_v26 = vld [vmem:[#allocation14_spill] sm:$0xff] }
 0x647   :  { %2375 = vmatpush1.msra.mxu0 %v4237_v27  ;;  %3226 = vmatpush3.msra.mxu1 %v4243_v28 }
 0x648   :  { %2376 = vmatprep.subr.mxu0 %v4249_v29  ;;  %3227 = vmatprep.subr.mxu1 %v4908_v13 }
 0x649   :  { %2377 = vmatpush1.msra.mxu0 %v4256_v30  ;;  %3228 = vmatpush3.msra.mxu1 %v4262_v31 }
 0x64a   :  { %2378 = vmatprep.subr.mxu0 %v4268_v32  ;;  %3229 = vmatprep.subr.mxu1 %v4908_v13 }
 0x64b   :  { %2379 = vmatpush1.msra.mxu0 %v4275_v33  ;;  %3230 = vmatpush3.msra.mxu1 %v4281_v34 }
 0x64c   :  { %2380 = vmatprep.subr.mxu0 %v4287_v35  ;;  %3231 = vmatprep.subr.mxu1 %v4908_v13  ;;  %v2054_v35 = vld [vmem:[#allocation2 + $0x6] ss:$8 sm:$0x7] }
 0x64d   :  { %2381 = vmatpush1.msra.mxu0 %v4294_v36  ;;  %3232 = vmatpush3.msra.mxu1 %v4300_v37  ;;  %v2328_v59 = vrot.slane %v2054_v35, 2 }
 0x64e   :  { %2382 = vmatprep.subr.mxu0 %v4306_v38  ;;  %3233 = vmatprep.subr.mxu1 %v4908_v13  ;;  %v2056_v38 = vld [vmem:[#allocation2 + $0x1e] ss:$8 sm:$0x7] }
 0x64f   :  { %2383 = vmatpush1.msra.mxu0 %v4313_v41  ;;  %3234 = vmatpush3.msra.mxu1 %v4319_v44  ;;  %v2329_v15 = vrot.slane %v2056_v38, 2 }
 0x650   :  { %2384 = vmatprep.subr.mxu0 %v4325_v47  ;;  %3235 = vmatprep.subr.mxu1 %v4908_v13 }
 0x651   :  { %2385 = vmatpush1.msra.mxu0 %v4332_v49  ;;  %3236 = vmatpush3.msra.mxu1 %v4338_v50  ;;  %v2257_v50 = vrot.slane %v2054_v35, 1 }
 0x652   :  { %2386 = vmatprep.subr.mxu0 %v4344_v51  ;;  %3237 = vmatprep.subr.mxu1 %v4908_v13 }
 0x653   :  { %2387 = vmatpush1.msra.mxu0 %v4351_v52  ;;  %3238 = vmatpush3.msra.mxu1 %v4357_v3  ;;  %v2258_v52 = vrot.slane %v2056_v38, 1 }
 0x654   :  { %2388 = vmatprep.subr.mxu0 %v4363_v55  ;;  %3239 = vmatprep.subr.mxu1 %v4908_v13 }
 0x655   :  { %2389 = vmatpush1.msra.mxu0 %v4370_v40  ;;  %3240 = vmatpush3.msra.mxu1 %v4376_v60 }
 0x656   :  { %2390 = vmatprep.subr.mxu0 %v4382_v39  ;;  %3241 = vmatprep.subr.mxu1 %v4908_v13 }
 0x657   :  { %2391 = vmatpush1.msra.mxu0 %v4389_v8  ;;  %3242 = vmatpush3.msra.mxu1 %v4395_v45 }
 0x658   :  { %2392 = vmatprep.subr.mxu0 %v4401_v63  ;;  %3243 = vmatprep.subr.mxu1 %v4908_v13 }
 0x659   :  { %2393 = vmatpush1.msra.mxu0 %v4408_v58  ;;  %3244 = vmatpush3.msra.mxu1 %v4414_v61  ;;  %v4966_v58 = vld [vmem:[#allocation15_spill] sm:$0xff] }
 0x65a   :  { %2394 = vmatprep.subr.mxu0 %v4957_v42  ;;  %3245 = vmatprep.subr.mxu1 %v4908_v13 }
 0x65b   :  { %2395 = vmatpush1.msra.mxu0 %v4958_v43  ;;  %3246 = vmatpush3.msra.mxu1 %v4959_v19 }
 0x65c   :  { %2396 = vmatprep.subr.mxu0 %v4960_v20  ;;  %3247 = vmatprep.subr.mxu1 %v4908_v13 }
 0x65d   :  { %2397 = vmatpush1.msra.mxu0 %v4961_v22  ;;  %3248 = vmatpush3.msra.mxu1 %v4962_v23 }
 0x65e   :  { %2398 = vmatprep.subr.mxu0 %v4963_v24  ;;  %3249 = vmatprep.subr.mxu1 %v4908_v13 }
 0x65f   :  { %2399 = vmatpush1.msra.mxu0 %v4964_v25  ;;  %2432 = vmatprep.mubr.f32.mxu0 %v4908_v13 }
 0x660   :  { %3250 = vmatpush3.msra.mxu1 %v4965_v26  ;;  %3251 = vmatprep.mubr.msk.f32.mxu1 %vm3503_vm2, %v4908_v13 }
 0x700   :  { %v2141_v27 = vpop.f32.mrf.mxu0  ;;  %v2212_v28 = vpop.f32.mrf.mxu1 }
 0x701   :  { %v2223_v29 = vrot.slane %v2141_v27, %v3963_v6  ;;  %v2300_v61 = vadd.f32 %v4966_v58, %v2212_v28  ;;  %v2674_v27 = vld [vmem:[%s4852_s5 + $0x68] sm:$0xff]  ;;  %v2673_v28 = vld [vmem:[%s4852_s5 + $0x60] sm:$0xff] }
 0x702   :  { %v2143_v30 = vpop.f32.mrf.mxu0  ;;  %v3218_v31 = vpop.f32.mrf.mxu1 }
 0x703   :  { %v2224_v32 = vcombine.high %v2223_v29, %v2223_v29  ;;  %v2231_v33 = vrot.slane %v2223_v29, %v3963_v6  ;;  %v2268_v34 = vrot.slane %v2143_v30, %v3963_v6  ;;  %v2308_v21 = vrot.slane %v2300_v61, %v3963_v6  ;;  %v2672_v29 = vld [vmem:[%s4852_s5 + $0x58] sm:$0xff]  ;;  %v2671_v30 = vld [vmem:[%s4852_s5 + $0x50] sm:$0xff]  ;;  %v2670_v31 = vld [vmem:[%s4852_s5 + $0x48] sm:$0xff] }
 0x705   :  { %v2238_v36 = vrot.slane %v2224_v32, %v3963_v6  ;;  %v2241_v37 = vadd.f32 %v2231_v33, %v2054_v35  ;;  %v2269_v41 = vcombine.high %v2268_v34, %v2268_v34  ;;  %v2276_v13 = vrot.slane %v2268_v34, %v3963_v6  ;;  %v2669_v32 = vld [vmem:[%s4852_s5 + $0x40] sm:$0xff]  ;;  %v2668_v33 = vld [vmem:[%s4852_s5 + $0x38] sm:$0xff]  ;;  %v2667_v34 = vld [vmem:[%s4852_s5 + $0x30] sm:$0xff] }
 0x706   :  { %v2309_v11 = vcombine.high %v2308_v21, %v2308_v21  ;;  %v2316_v54 = vrot.slane %v2308_v21, %v3963_v6  ;;  %v2666_v35 = vld [vmem:[%s4852_s5 + $0x28] sm:$0xff] }
 0x707   :  { %v2242_v44 = vadd.f32 %v2238_v36, %v2056_v38  ;;  %v2801_v47 = vmul.f32 -1.442695, %v2241_v37  ;;  %v2283_v51 = vrot.slane %v2269_v41, %v3963_v6  ;;  %v2286_v3 = vadd.f32 %v2276_v13, %v2257_v50  ;;  %v2665_v36 = vld [vmem:[%s4852_s5 + $0x20] sm:$0xff]  ;;  %v2664_v37 = vld [vmem:[%s4852_s5 + $0x18] sm:$0xff]  ;;  %v2663_v38 = vld [vmem:[%s4852_s5 + $0x10] sm:$0xff] }
 0x708   :  { %v2323_v48 = vrot.slane %v2309_v11, %v3963_v6  ;;  %v2662_v41 = vld [vmem:[%s4852_s5 + $0x8] sm:$0xff] }
 0x709   :  { %3413 = vpow2.f32 %v2801_v47  ;;  %v2802_v49 = vmul.f32 -1.442695, %v2242_v44  ;;  %v2287_v55 = vadd.f32 %v2283_v51, %v2258_v52  ;;  %v2803_v40 = vmul.f32 -1.442695, %v2286_v3  ;;  %v2661_v44 = vld [vmem:[%s4852_s5] sm:$0xff] }
 0x70b   :  { %3415 = vpow2.f32 %v2802_v49  ;;  %v2804_v60 = vmul.f32 -1.442695, %v2287_v55 }
 0x70c   :  { %3417 = vpow2.f32 %v2803_v40  ;;  %v2347_v40 = vld [vmem:[#allocation2 + $0x7] ss:$8 sm:$0x7] }
 0x70d   :  { %3419 = vpow2.f32 %v2804_v60 }
 0x716   :  { %v3414_v39 = vpop.eup %3413 }
 0x717   :  { %v2249_v8 = vadd.f32 1.0, %v3414_v39 }
 0x718   :  { %v3416_v45 = vpop.eup %3415 }
 0x719   :  { %v2250_v63 = vadd.f32 1.0, %v3416_v45  ;;  %3421 = vrcp.f32 %v2249_v8  ;;  %v3418_v53 = vpop.eup %3417  ;;  %v2349_v8 = vld [vmem:[#allocation2 + $0x1f] ss:$8 sm:$0x7] }
 0x71a   :  { %v3420_v4 = vpop.eup %3419  ;;  %v2294_v2 = vadd.f32 1.0, %v3418_v53 }
 0x71b   :  { %3423 = vrcp.f32 %v2250_v63  ;;  %v2295_v1 = vadd.f32 1.0, %v3420_v4  ;;  %v2550_v4 = vrot.slane %v2347_v40, 1 }
 0x71c   :  { %3425 = vrcp.f32 %v2294_v2  ;;  %v2551_v2 = vrot.slane %v2349_v8, 1 }
 0x71d   :  { %3427 = vrcp.f32 %v2295_v1 }
 0x726   :  { %v3422_v10 = vpop.eup %3421 }
 0x727   :  { %v2326_v18 = vmul.f32 %v3422_v10, %v2316_v54 }
 0x728   :  { %v3424_v57 = vpop.eup %3423 }
 0x729   :  { %v2327_v62 = vmul.f32 %v3424_v57, %v2323_v48  ;;  %v2332_v46 = vadd.f32 %v2328_v59, %v2326_v18  ;;  %v3426_v56 = vpop.eup %3425 }
 0x72a   :  { %v3428_v9 = vpop.eup %3427  ;;  %v2336_v16 = vsub.f32 1.0, %v3426_v56  ;;  %v2340_v42 = vmul.f32 %v3426_v56, %v4674_v7  ;;  %v2676_v7 = vld [vmem:[%s4852_s5 + $0x78] sm:$0xff] }
 0x72b   :  { %v2333_v14 = vadd.f32 %v2329_v15, %v2327_v62  ;;  %3429 = vtanh.f32 %v2332_v46  ;;  %v2337_v12 = vsub.f32 1.0, %v3428_v9  ;;  %v2341_v20 = vmul.f32 %v3428_v9, %v4676_v5  ;;  %3254 = vmatprep.subr.mxu0 %v2676_v7  ;;  %v2675_v5 = vld [vmem:[%s4852_s5 + $0x70] sm:$0xff] }
 0x72d   :  { %3431 = vtanh.f32 %v2333_v14 }
 0x738   :  { %v3430_v0 = vpop.eup %3429 }
 0x739   :  { %v2338_v17 = vmul.f32 %v3430_v0, %v2336_v16 }
 0x73a   :  { %v3432_v43 = vpop.eup %3431 }
 0x73b   :  { %v2339_v19 = vmul.f32 %v3432_v43, %v2337_v12  ;;  %v4761_v22 = vadd.f32 %v2340_v42, %v2338_v17  ;;  %v2621_v42 = vrot.slane %v2347_v40, 2 }
 0x73d   :  { %v4763_v23 = vadd.f32 %v2341_v20, %v2339_v19  ;;  %2344 = vst [vmem:[#allocation3 + $0x6] sm:$0x1] %v4761_v22 }
 0x73f   :  { %2345 = vst [vmem:[#allocation3 + $0xe] sm:$0x1] %v4763_v23  ;;  %v2352_v24 = vcombine.low %v4761_v22, %v4763_v23 }
 0x741   :  { %v2359_v25 = vrot.slane %v2352_v24, %v3963_v6  ;;  %v2622_v24 = vrot.slane %v2349_v8, 2 }
 0x743   :  { %v2366_v26 = vrot.slane %v2359_v25, %v3963_v6 }
 0x745   :  { %2433 = vmatmul.mubr.f32.vlgmr.msra.gmra.mxu0 %v2366_v26  ;;  %3252 = vmatmul.mubr.f32.vlgmr.msra.gmra.mxu1 %v2366_v26 }
 0x746   :  { %3255 = vmatpush3.msra.mxu0 %v2676_v7 }
 0x747   :  { %3256 = vmatprep.subr.mxu0 %v2675_v5 }
 0x748   :  { %3257 = vmatpush3.msra.mxu0 %v2675_v5 }
 0x749   :  { %3258 = vmatprep.subr.mxu0 %v2674_v27 }
 0x74a   :  { %3259 = vmatpush3.msra.mxu0 %v2674_v27 }
 0x74b   :  { %3260 = vmatprep.subr.mxu0 %v2673_v28 }
 0x74c   :  { %3261 = vmatpush3.msra.mxu0 %v2673_v28 }
 0x74d   :  { %3262 = vmatprep.subr.mxu0 %v2672_v29 }
 0x74e   :  { %3263 = vmatpush3.msra.mxu0 %v2672_v29 }
 0x74f   :  { %3264 = vmatprep.subr.mxu0 %v2671_v30 }
 0x750   :  { %3265 = vmatpush3.msra.mxu0 %v2671_v30 }
 0x751   :  { %3266 = vmatprep.subr.mxu0 %v2670_v31 }
 0x752   :  { %3267 = vmatpush3.msra.mxu0 %v2670_v31 }
 0x753   :  { %3268 = vmatprep.subr.mxu0 %v2669_v32 }
 0x754   :  { %3269 = vmatpush3.msra.mxu0 %v2669_v32 }
 0x755   :  { %3270 = vmatprep.subr.mxu0 %v2668_v33 }
 0x756   :  { %3271 = vmatpush3.msra.mxu0 %v2668_v33 }
 0x757   :  { %3272 = vmatprep.subr.mxu0 %v2667_v34 }
 0x758   :  { %3273 = vmatpush3.msra.mxu0 %v2667_v34 }
 0x759   :  { %3274 = vmatprep.subr.mxu0 %v2666_v35 }
 0x75a   :  { %3275 = vmatpush3.msra.mxu0 %v2666_v35 }
 0x75b   :  { %3276 = vmatprep.subr.mxu0 %v2665_v36 }
 0x75c   :  { %3277 = vmatpush3.msra.mxu0 %v2665_v36 }
 0x75d   :  { %3278 = vmatprep.subr.mxu0 %v2664_v37 }
 0x75e   :  { %3279 = vmatpush3.msra.mxu0 %v2664_v37 }
 0x75f   :  { %3280 = vmatprep.subr.mxu0 %v2663_v38 }
 0x760   :  { %3281 = vmatpush3.msra.mxu0 %v2663_v38 }
 0x761   :  { %3282 = vmatprep.subr.mxu0 %v2662_v41 }
 0x762   :  { %3283 = vmatpush3.msra.mxu0 %v2662_v41 }
 0x763   :  { %3284 = vmatprep.subr.mxu0 %v2661_v44 }
 0x764   :  { %3285 = vmatpush3.msra.mxu0 %v2661_v44 }
 0x805   :  { %v2434_v47 = vpop.f32.mrf.mxu0  ;;  %v2505_v13 = vpop.f32.mrf.mxu1 }
 0x806   :  { %v2516_v49 = vrot.slane %v2434_v47, %v3963_v6  ;;  %v2593_v62 = vadd.f32 %v4966_v58, %v2505_v13 }
 0x807   :  { %v2436_v50 = vpop.f32.mrf.mxu0  ;;  %v3253_v51 = vpop.f32.mrf.mxu1 }
 0x808   :  { %v2517_v52 = vcombine.high %v2516_v49, %v2516_v49  ;;  %v2524_v3 = vrot.slane %v2516_v49, %v3963_v6  ;;  %v2561_v55 = vrot.slane %v2436_v50, %v3963_v6  ;;  %v2601_v46 = vrot.slane %v2593_v62, %v3963_v6 }
 0x80a   :  { %v2531_v60 = vrot.slane %v2517_v52, %v3963_v6  ;;  %v2534_v39 = vadd.f32 %v2524_v3, %v2347_v40  ;;  %v2562_v45 = vcombine.high %v2561_v55, %v2561_v55  ;;  %v2569_v21 = vrot.slane %v2561_v55, %v3963_v6 }
 0x80b   :  { %v2602_v9 = vcombine.high %v2601_v46, %v2601_v46  ;;  %v2609_v0 = vrot.slane %v2601_v46, %v3963_v6 }
 0x80c   :  { %v2535_v63 = vadd.f32 %v2531_v60, %v2349_v8  ;;  %v2805_v61 = vmul.f32 -1.442695, %v2534_v39  ;;  %v2576_v11 = vrot.slane %v2562_v45, %v3963_v6  ;;  %v2579_v54 = vadd.f32 %v2569_v21, %v2550_v4 }
 0x80d   :  { %v2616_v43 = vrot.slane %v2602_v9, %v3963_v6 }
 0x80e   :  { %3433 = vpow2.f32 %v2805_v61  ;;  %v2806_v53 = vmul.f32 -1.442695, %v2535_v63  ;;  %v2580_v1 = vadd.f32 %v2576_v11, %v2551_v2  ;;  %v2807_v10 = vmul.f32 -1.442695, %v2579_v54 }
 0x810   :  { %3435 = vpow2.f32 %v2806_v53  ;;  %v2808_v59 = vmul.f32 -1.442695, %v2580_v1 }
 0x811   :  { %3437 = vpow2.f32 %v2807_v10 }
 0x812   :  { %3439 = vpow2.f32 %v2808_v59 }
 0x81b   :  { %v3434_v48 = vpop.eup %3433 }
 0x81c   :  { %v2542_v18 = vadd.f32 1.0, %v3434_v48 }
 0x81d   :  { %v3436_v57 = vpop.eup %3435 }
 0x81e   :  { %v2543_v15 = vadd.f32 1.0, %v3436_v57  ;;  %3441 = vrcp.f32 %v2542_v18  ;;  %v3438_v14 = vpop.eup %3437 }
 0x81f   :  { %v3440_v56 = vpop.eup %3439  ;;  %v2587_v16 = vadd.f32 1.0, %v3438_v14 }
 0x820   :  { %3443 = vrcp.f32 %v2543_v15  ;;  %v2588_v12 = vadd.f32 1.0, %v3440_v56 }
 0x821   :  { %3445 = vrcp.f32 %v2587_v16 }
 0x822   :  { %3447 = vrcp.f32 %v2588_v12 }
 0x82b   :  { %v3442_v17 = vpop.eup %3441 }
 0x82c   :  { %v2619_v19 = vmul.f32 %v3442_v17, %v2609_v0 }
 0x82d   :  { %v3444_v20 = vpop.eup %3443 }
 0x82e   :  { %v2620_v25 = vmul.f32 %v3444_v20, %v2616_v43  ;;  %v2625_v26 = vadd.f32 %v2621_v42, %v2619_v19  ;;  %v3446_v7 = vpop.eup %3445 }
 0x82f   :  { %v3448_v5 = vpop.eup %3447  ;;  %v2629_v27 = vsub.f32 1.0, %v3446_v7  ;;  %v2633_v31 = vmul.f32 %v3446_v7, %v4761_v22  ;;  %v2811_v22 = vld [vmem:[%s4854_s6] ss:$0 sm:$0xff] }
 0x830   :  { %v2626_v58 = vadd.f32 %v2622_v24, %v2620_v25  ;;  %3449 = vtanh.f32 %v2625_v26  ;;  %v2630_v29 = vsub.f32 1.0, %v3448_v5  ;;  %v2634_v34 = vmul.f32 %v3448_v5, %v4763_v23 }
 0x832   :  { %3451 = vtanh.f32 %v2626_v58 }
 0x83d   :  { %v3450_v28 = vpop.eup %3449 }
 0x83e   :  { %v2631_v30 = vmul.f32 %v3450_v28, %v2629_v27 }
 0x83f   :  { %v3452_v32 = vpop.eup %3451 }
 0x840   :  { %v2632_v33 = vmul.f32 %v3452_v32, %v2630_v29  ;;  %v2635_v35 = vadd.f32 %v2633_v31, %v2631_v30 }
 0x842   :  { %v2636_v36 = vadd.f32 %v2634_v34, %v2632_v33  ;;  %2637 = vst [vmem:[#allocation3 + $0x7] sm:$0x1] %v2635_v35 }
 0x844   :  { %2638 = vst [vmem:[#allocation3 + $0xf] sm:$0x1] %v2636_v36  ;;  %v2641_v37 = vcombine.low %v2635_v35, %v2636_v36 }
 0x846   :  { %v2648_v38 = vrot.slane %v2641_v37, %v3963_v6 }
 0x848   :  { %2809 = vst.sshfl [vmem:[#allocation4] sm:$0x5 pattern:$0x73625140] %v2648_v38 }
 0x849   :  { %2810 = vst.sshfl [vmem:[%s4853_s9] sm:$0x5 pattern:$0x73625140] %v2648_v38  ;;  %v2659_v41 = vld [vmem:[#allocation3] sm:$0xff] }
 0x84a   :  { %3286 = vmatprep.mubr.f32.mxu0 %v2659_v41 }
 0x84b   :  { %v2660_v44 = vld [vmem:[#allocation3 + $0x8] sm:$0xff] }
 0x84c   :  { %3287 = vmatmul.mubr.f32.vlgmr.msra.gmra.mxu0 %v2660_v44 }
 0x90c   :  { %v3288_v23 = vpop.f32.mrf.mxu0 }
 0x90d   :  { %v2756_v47 = vadd.f32 %v3288_v23, %v2811_v22 }
 0x90e   :  { %v2750_v13 = vpop.f32.mrf.mxu0 }
 0x90f   :  { %2760 = vst.msk [vmem:[%s4855_s8 + $0x8] sm:$0xff] %vm61_vm1, %v2756_v47  ;;  %v2751_v6 = vadd.f32 %v2811_v22, %v2750_v13 }
 0x911   :  { %2759 = vst.msk [vmem:[%s4855_s8] sm:$0xff] %vm61_vm1, %v2751_v6 }

</bundles_post_ra>
